<compile_context>
chip_gen: v7x
topology: tpu7x:2x2x1
jax: 0.10.0
libtpu: 0.0.40
codegen_flags: <defaults>
</compile_context>

<pallas_src>
import jax
import jax.numpy as jnp
from jax.experimental import pallas as pl
from jax.experimental.pallas import tpu as pltpu


# ---------------------------------------------------------------------------
# Small helpers
# ---------------------------------------------------------------------------
def _round_up(n: int, m: int) -> int:
    return ((n + m - 1) // m) * m


def _pad2d(a, rows: int, cols: int):
    r, c = a.shape
    if r == rows and c == cols:
        return a
    return jnp.pad(a, ((0, rows - r), (0, cols - c)))


def _device_kind() -> str:
    try:
        return jax.devices()[0].device_kind.lower()
    except Exception:
        return ""


def _vmem_capacity_bytes() -> int:
    """Per-TensorCore VMEM capacity; conservative fallback if not on TPU."""
    try:
        cap = getattr(pltpu.get_tpu_info(), "vmem_capacity_bytes", None)
        if cap:
            return int(cap)
    except Exception:
        pass
    return 64 * 1024 * 1024  # v7x per-TC VMEM (most conservative generation)


def _mxu_lane_width(kind: str) -> int:
    # v6e / v7x have a 2x256^2 MXU -> pad K/N feature dims to 256; v5e: 128.
    return 256 if ("v6" in kind or "v7" in kind) else 128


def _num_tensorcores(kind: str) -> int:
    # v7x exposes 2 TensorCores per chip; v5e/v6e have one.
    return 2 if "v7" in kind else 1


# ---------------------------------------------------------------------------
# Kernel factory
# ---------------------------------------------------------------------------
def _make_mlp_kernel(is_reg: bool, n_class: int, extra_layer: bool, kt: int):
    """Fused MLP kernel body. kt = number of K-reduction tiles for fc0."""

    def finish(h0_f32, b0, w1_ref, b1_ref, extra, w3_ref, b3_ref, o_ref):
        # fc0 epilogue (bias + ReLU), then fc1..fc3 (+ activation).
        h = jnp.maximum(h0_f32 + b0, 0.0).astype(w1_ref.dtype)
        h = jnp.dot(h, w1_ref[...], preferred_element_type=jnp.float32) + b1_ref[...]
        h = jnp.maximum(h, 0.0).astype(w3_ref.dtype)
        if extra_layer:
            w2_ref, b2_ref = extra
            h = jnp.dot(h, w2_ref[...], preferred_element_type=jnp.float32) + b2_ref[...]
            h = jnp.maximum(h, 0.0).astype(w3_ref.dtype)
        y = jnp.dot(h, w3_ref[...], preferred_element_type=jnp.float32) + b3_ref[...]
        if not is_reg:
            if n_class == 1:
                y = jax.nn.sigmoid(y)
            else:
                # Mask padded class lanes, then an exactly-normalized softmax
                # (exact division: rows must sum to 1 for downstream code).
                col = jax.lax.broadcasted_iota(jnp.int32, y.shape, 1)
                y = jnp.where(col < n_class, y, -1e30)
                y_max = jnp.max(y, axis=-1, keepdims=True)
                e = jnp.exp(y - y_max)
                y = e / jnp.sum(e, axis=-1, keepdims=True)
        o_ref[...] = y.astype(o_ref.dtype)

    if kt == 1:
        # Everything (including w0) is VMEM-resident; single pass per tile.
        def kernel(x_ref, w0_ref, b0_ref, w1_ref, b1_ref, *rest):
            if extra_layer:
                w2_ref, b2_ref, w3_ref, b3_ref, o_ref = rest
                extra = (w2_ref, b2_ref)
            else:
                w3_ref, b3_ref, o_ref = rest
                extra = ()
            h0 = jnp.dot(x_ref[...], w0_ref[...],
                         preferred_element_type=jnp.float32)
            finish(h0, b0_ref[...], w1_ref, b1_ref, extra, w3_ref, b3_ref, o_ref)
        return kernel

    # K-tiled fc0: w0 streamed as (tk, h1) tiles, f32 accumulator scratch.
    def kernel(x_ref, w0_ref, b0_ref, w1_ref, b1_ref, *rest):
        if extra_layer:
            w2_ref, b2_ref, w3_ref, b3_ref, o_ref, acc_ref = rest
            extra = (w2_ref, b2_ref)
        else:
            w3_ref, b3_ref, o_ref, acc_ref = rest
            extra = ()
        k = pl.program_id(1)

        @pl.when(k == 0)
        def _():
            acc_ref[...] = jnp.zeros_like(acc_ref)

        acc_ref[...] += jnp.dot(x_ref[...], w0_ref[...],
                                preferred_element_type=jnp.float32)

        @pl.when(k == kt - 1)
        def _():
            finish(acc_ref[...], b0_ref[...], w1_ref, b1_ref, extra,
                   w3_ref, b3_ref, o_ref)

    return kernel


# ---------------------------------------------------------------------------
# Wrapper
# ---------------------------------------------------------------------------
def st_fully_connected_forward(x, params, *, is_reg=True, n_class=1,
                               extra_layer=False, tm=512, max_k_tile=None,
                               x_buffers=None):
    """Pallas forward for STFullyConnected (eval mode; dropout is identity).

    x       : (M, n_dim) float32
    params  : dict with 'w0','b0','w1','b1',('w2','b2'),'w3','b3'
              weights transposed to (in, out); biases (1, out); all f32.
    Returns : (M, n_out) float32, n_out = 1 if is_reg else n_class
    """
    M, n_dim = x.shape
    n_out = 1 if is_reg else n_class
    h1 = params["w0"].shape[1]
    hx = params["w1"].shape[1]

    kind = _device_kind()
    lane = _mxu_lane_width(kind)          # 256 on v6e/v7x, 128 on v5e
    num_cores = _num_tensorcores(kind)    # 2 on v7x, else 1
    vmem_cap = _vmem_capacity_bytes()     # per-TensorCore

    # ---- Feature-dim padding: full-width MXU passes, lane-dense output ----
    n_dim_p = _round_up(n_dim, lane)
    h1_p = _round_up(h1, lane)
    hx_p = _round_up(hx, lane)
    n_out_p = _round_up(n_out, 128)       # 128 lanes is enough for dense vst

    # ---- Batch tiling: 128-aligned tiles, no artificial splits on 1-TC ----
    tm = max(128, _round_up(tm, 128))
    M_p = _round_up(max(M, 1), 128)
    tm_eff = min(tm, M_p)
    g = pl.cdiv(M_p, tm_eff)
    M_p = g * tm_eff
    if num_cores >= 2 and g < num_cores and M_p >= num_cores * 128:
        # Split the batch across TensorCores only on multi-TC parts (v7x).
        tm_eff = _round_up(pl.cdiv(M_p, num_cores), 128)
        g = pl.cdiv(M_p, tm_eff)
        M_p = g * tm_eff

    out_dtype = jnp.bfloat16 if is_reg else jnp.float32
    out_itemsize = 2 if is_reg else 4

    # ---- VMEM budgeting (per TensorCore) & fc0 K-tiling decision ----------
    budget = int(0.85 * vmem_cap)
    other_resident = ((h1_p * hx_p + (hx_p * hx_p if extra_layer else 0)
                       + hx_p * n_out_p) * 2                       # bf16 weights
                      + (h1_p + hx_p * (2 if extra_layer else 1)
                         + n_out_p) * 4)                           # f32 biases
    act_bytes = tm_eff * (h1_p + hx_p) * (4 + 2) + tm_eff * n_out_p * 4
    out_stream = 2 * tm_eff * n_out_p * out_itemsize
    w0_full = n_dim_p * h1_p * 2
    x_full_stream = 2 * tm_eff * n_dim_p * 2
    need_full = other_resident + w0_full + x_full_stream + act_bytes + out_stream

    force_tile = max_k_tile is not None and _round_up(max_k_tile, lane) < n_dim_p
    if need_full <= budget and not force_tile:
        kt, tk = 1, n_dim_p
    else:
        acc_bytes = tm_eff * h1_p * 4
        leftover = budget - (other_resident + act_bytes + out_stream + acc_bytes)
        per_col = 2 * (tm_eff + h1_p) * 2       # bf16, double-buffered X + w0 col
        tk = max(lane, (max(leftover, 0) // per_col) // lane * lane)
        tk = min(tk, n_dim_p)
        if max_k_tile is not None:
            tk = min(tk, max(lane, _round_up(max_k_tile, lane)))
        kt = pl.cdiv(n_dim_p, tk)
        n_dim_p = kt * tk                        # keep K evenly divisible

    # ---- Pad + cast operands (weights bf16 for the MXU, biases f32) -------
    x_p = _pad2d(x, M_p, n_dim_p).astype(jnp.bfloat16)
    w0 = _pad2d(params["w0"], n_dim_p, h1_p).astype(jnp.bfloat16)
    b0 = _pad2d(params["b0"], 1, h1_p).astype(jnp.float32)
    w1 = _pad2d(params["w1"], h1_p, hx_p).astype(jnp.bfloat16)
    b1 = _pad2d(params["b1"], 1, hx_p).astype(jnp.float32)
    operands = [x_p, w0, b0, w1, b1]
    if extra_layer:
        operands += [_pad2d(params["w2"], hx_p, hx_p).astype(jnp.bfloat16),
                     _pad2d(params["b2"], 1, hx_p).astype(jnp.float32)]
    operands += [_pad2d(params["w3"], hx_p, n_out_p).astype(jnp.bfloat16),
                 _pad2d(params["b3"], 1, n_out_p).astype(jnp.float32)]

    # ---- BlockSpecs --------------------------------------------------------
    vmem_full = pl.BlockSpec(memory_space=pltpu.MemorySpace.VMEM)
    if kt == 1:
        x_spec = pl.BlockSpec((tm_eff, n_dim_p), lambda i, k: (i, 0))
        if x_buffers:  # optional deeper X pipelining if xprof shows exposed DMA
            x_spec = pl.BlockSpec((tm_eff, n_dim_p), lambda i, k: (i, 0),
                                  pipeline_mode=pl.Buffered(x_buffers))
        w0_spec = vmem_full
        scratch_shapes = []
    else:
        x_spec = pl.BlockSpec((tm_eff, tk), lambda i, k: (i, k))
        w0_spec = pl.BlockSpec((tk, h1_p), lambda i, k: (k, 0))
        scratch_shapes = [pltpu.VMEM((tm_eff, h1_p), jnp.float32)]
    in_specs = [x_spec, w0_spec] + [vmem_full] * (len(operands) - 2)
    out_spec = pl.BlockSpec((tm_eff, n_out_p), lambda i, k: (i, 0))

    # ---- VMEM limit: actual residency + activations + headroom, per-gen cap
    if kt == 1:
        needed = need_full
    else:
        needed = (other_resident + act_bytes + out_stream
                  + tm_eff * h1_p * 4 + 2 * (tm_eff * tk + tk * h1_p) * 2)
    vmem_limit = int(min(max(needed + needed // 4 + (2 << 20), 32 << 20),
                         int(0.9 * vmem_cap)))
    # TODO(synk): if `needed` still exceeds ~0.9*vmem_cap (extreme hidden sizes),
    # also K-tile fc1/fc2 instead of keeping them fully resident.

    kernel = _make_mlp_kernel(is_reg, n_class, extra_layer, kt)

    out = pl.pallas_call(
        kernel,
        out_shape=jax.ShapeDtypeStruct((M_p, n_out_p), out_dtype),
        grid_spec=pltpu.PrefetchScalarGridSpec(
            num_scalar_prefetch=0,
            grid=(g, kt),
            in_specs=in_specs,
            out_specs=out_spec,
            scratch_shapes=scratch_shapes,
        ),
        compiler_params=pltpu.CompilerParams(
            dimension_semantics=("parallel", "arbitrary"),
            vmem_limit_bytes=vmem_limit,
        ),
    )(*operands)

    # Drop padded rows / lanes; return f32 regardless of on-chip output dtype.
    return out[:M, :n_out].astype(jnp.float32)


# ---------------------------------------------------------------------------
# Param init (mimics torch.nn.Linear default: uniform +-1/sqrt(fan_in)),
# stored already transposed to (in, out), bias (1, out).
# ---------------------------------------------------------------------------
def _init_linear(key, fan_in, fan_out):
    kw, kb = jax.random.split(key)
    bound = 1.0 / jnp.sqrt(jnp.float32(fan_in))
    w = jax.random.uniform(kw, (fan_in, fan_out), jnp.float32, -bound, bound)
    b = jax.random.uniform(kb, (1, fan_out), jnp.float32, -bound, bound)
    return w, b


def init_st_fully_connected_params(key, n_dim, neurons_h1, neurons_hx,
                                   n_class=1, is_reg=True, extra_layer=False):
    n_out = 1 if is_reg else n_class
    keys = jax.random.split(key, 4)
    params = {}
    params["w0"], params["b0"] = _init_linear(keys[0], n_dim, neurons_h1)
    params["w1"], params["b1"] = _init_linear(keys[1], neurons_h1, neurons_hx)
    if extra_layer:
        params["w2"], params["b2"] = _init_linear(keys[2], neurons_hx, neurons_hx)
    params["w3"], params["b3"] = _init_linear(keys[3], neurons_hx, n_out)
    return params


# ---------------------------------------------------------------------------
# bf16-parity reference (same bf16 matmul inputs / f32 accumulation as kernel)
# ---------------------------------------------------------------------------
def _reference_forward(x, params, *, is_reg=True, n_class=1, extra_layer=False):
    def lin(h, w, b):
        return jnp.dot(h.astype(jnp.bfloat16), w.astype(jnp.bfloat16),
                       preferred_element_type=jnp.float32) + b

    h = jnp.maximum(lin(x, params["w0"], params["b0"]), 0.0)
    h = jnp.maximum(lin(h, params["w1"], params["b1"]), 0.0)
    if extra_layer:
        h = jnp.maximum(lin(h, params["w2"], params["b2"]), 0.0)
    y = lin(h, params["w3"], params["b3"])
    if not is_reg:
        y = jax.nn.sigmoid(y) if n_class == 1 else jax.nn.softmax(y, axis=-1)
    return y


if __name__ == "__main__":
    key = jax.random.PRNGKey(0)
    k1, k2, k3, k4, k5, k6 = jax.random.split(key, 6)

    # --- Case A: regression, uneven feature sizes (exercises lane padding) --
    M, n_dim, h1, hx = 256, 200, 160, 96
    x = jax.random.normal(k1, (M, n_dim), jnp.float32)
    params = init_st_fully_connected_params(
        k2, n_dim, h1, hx, n_class=1, is_reg=True, extra_layer=False)
    y = jax.block_until_ready(
        st_fully_connected_forward(x, params, is_reg=True, n_class=1,
                                   extra_layer=False))
    y_ref = _reference_forward(x, params, is_reg=True, n_class=1,
                               extra_layer=False)
    assert y.shape == (M, 1)
    assert jnp.allclose(y, y_ref, atol=2e-3, rtol=2e-3), "regression mismatch"

    # --- Case B: 3-class softmax, extra layer, non-multiple batch size ------
    M2, n_dim2, h12, hx2, n_class2 = 100, 96, 80, 64, 3
    x2 = jax.random.normal(k3, (M2, n_dim2), jnp.float32)
    params2 = init_st_fully_connected_params(
        k4, n_dim2, h12, hx2, n_class=n_class2, is_reg=False, extra_layer=True)
    y2 = jax.block_until_ready(
        st_fully_connected_forward(x2, params2, is_reg=False, n_class=n_class2,
                                   extra_layer=True))
    y2_ref = _reference_forward(x2, params2, is_reg=False, n_class=n_class2,
                                extra_layer=True)
    assert y2.shape == (M2, n_class2)
    assert jnp.allclose(y2, y2_ref, atol=2e-3, rtol=2e-3), "softmax mismatch"
    assert jnp.allclose(jnp.sum(y2, axis=-1), 1.0, atol=2e-3), \
        "softmax not normalized"

    # --- Case C: force the K-tiled fc0 path (accumulator + pipelined w0) ----
    M3, n_dim3, h13, hx3 = 128, 300, 96, 64
    x3 = jax.random.normal(k5, (M3, n_dim3), jnp.float32)
    params3 = init_st_fully_connected_params(
        k6, n_dim3, h13, hx3, n_class=1, is_reg=True, extra_layer=False)
    y3 = jax.block_until_ready(
        st_fully_connected_forward(x3, params3, is_reg=True, n_class=1,
                                   extra_layer=False, max_k_tile=128))
    y3_ref = _reference_forward(x3, params3, is_reg=True, n_class=1,
                                extra_layer=False)
    assert y3.shape == (M3, 1)
    assert jnp.allclose(y3, y3_ref, atol=2e-3, rtol=2e-3), "k-tiled mismatch"

    print("KERNEL_OK")
</pallas_src>

<mosaic_0001>
module attributes {stable_mosaic.version = 11 : i64} {
  func.func @kernel(%arg0: i32, %arg1: i32, %arg2: memref<256x256xbf16, #tpu.memory_space<vmem>>, %arg3: memref<256x256xbf16, #tpu.memory_space<vmem>>, %arg4: memref<1x256xf32, #tpu.memory_space<vmem>>, %arg5: memref<256x128xbf16, #tpu.memory_space<vmem>>, %arg6: memref<1x128xf32, #tpu.memory_space<vmem>>, %arg7: memref<128x128xbf16, #tpu.memory_space<vmem>>, %arg8: memref<1x128xf32, #tpu.memory_space<vmem>>, %arg9: memref<256x128xbf16, #tpu.memory_space<vmem>>) attributes {dimension_semantics = [#tpu.dimension_semantics<parallel>, #tpu.dimension_semantics<arbitrary>], iteration_bounds = array<i64: 1, 1>, scalar_prefetch = 0 : i64, scratch_operands = 0 : i64, tpu.core_type = #tpu.core_type<tc>, window_params = [{transform_indices = @transform_0, window_bounds = array<i64: 256, 256>}, {pipeline_mode = #tpu.pipeline_mode<synchronous>, transform_indices = @transform_1, window_bounds = array<i64: 256, 256>}, {pipeline_mode = #tpu.pipeline_mode<synchronous>, transform_indices = @transform_2, window_bounds = array<i64: 1, 256>}, {pipeline_mode = #tpu.pipeline_mode<synchronous>, transform_indices = @transform_3, window_bounds = array<i64: 256, 128>}, {pipeline_mode = #tpu.pipeline_mode<synchronous>, transform_indices = @transform_4, window_bounds = array<i64: 1, 128>}, {pipeline_mode = #tpu.pipeline_mode<synchronous>, transform_indices = @transform_5, window_bounds = array<i64: 128, 128>}, {pipeline_mode = #tpu.pipeline_mode<synchronous>, transform_indices = @transform_6, window_bounds = array<i64: 1, 128>}, {transform_indices = @transform_7, window_bounds = array<i64: 256, 128>}]} {
    %c0 = arith.constant 0 : index
    %c0_0 = arith.constant 0 : index
    %0 = vector.load %arg2[%c0, %c0_0] : memref<256x256xbf16, #tpu.memory_space<vmem>>, vector<256x256xbf16>
    %c0_1 = arith.constant 0 : index
    %c0_2 = arith.constant 0 : index
    %1 = vector.load %arg3[%c0_1, %c0_2] : memref<256x256xbf16, #tpu.memory_space<vmem>>, vector<256x256xbf16>
    %cst = arith.constant dense<0.000000e+00> : vector<256x256xf32>
    %2 = tpu.matmul %0, %1, %cst {dimension_numbers = #tpu.dot_dimension_numbers<[1], [0], [0], [1], [0, 0, 1, 1], [], []>} : vector<256x256xbf16>, vector<256x256xbf16>, vector<256x256xf32> -> vector<256x256xf32>
    %c0_3 = arith.constant 0 : index
    %c0_4 = arith.constant 0 : index
    %3 = vector.load %arg4[%c0_3, %c0_4] : memref<1x256xf32, #tpu.memory_space<vmem>>, vector<1x256xf32>
    %4 = vector.broadcast %3 : vector<1x256xf32> to vector<256x256xf32>
    %5 = arith.addf %2, %4 : vector<256x256xf32>
    %cst_5 = arith.constant 0.000000e+00 : f32
    %6 = vector.broadcast %cst_5 : f32 to vector<256x256xf32>
    %7 = arith.maximumf %5, %6 : vector<256x256xf32>
    %8 = arith.truncf %7 : vector<256x256xf32> to vector<256x256xbf16>
    %c0_6 = arith.constant 0 : index
    %c0_7 = arith.constant 0 : index
    %9 = vector.load %arg5[%c0_6, %c0_7] : memref<256x128xbf16, #tpu.memory_space<vmem>>, vector<256x128xbf16>
    %cst_8 = arith.constant dense<0.000000e+00> : vector<256x128xf32>
    %10 = tpu.matmul %8, %9, %cst_8 {dimension_numbers = #tpu.dot_dimension_numbers<[1], [0], [0], [1], [0, 0, 1, 1], [], []>} : vector<256x256xbf16>, vector<256x128xbf16>, vector<256x128xf32> -> vector<256x128xf32>
    %c0_9 = arith.constant 0 : index
    %c0_10 = arith.constant 0 : index
    %11 = vector.load %arg6[%c0_9, %c0_10] : memref<1x128xf32, #tpu.memory_space<vmem>>, vector<1x128xf32>
    %12 = vector.broadcast %11 : vector<1x128xf32> to vector<256x128xf32>
    %13 = arith.addf %10, %12 : vector<256x128xf32>
    %cst_11 = arith.constant 0.000000e+00 : f32
    %14 = vector.broadcast %cst_11 : f32 to vector<256x128xf32>
    %15 = arith.maximumf %13, %14 : vector<256x128xf32>
    %16 = arith.truncf %15 : vector<256x128xf32> to vector<256x128xbf16>
    %c0_12 = arith.constant 0 : index
    %c0_13 = arith.constant 0 : index
    %17 = vector.load %arg7[%c0_12, %c0_13] : memref<128x128xbf16, #tpu.memory_space<vmem>>, vector<128x128xbf16>
    %cst_14 = arith.constant dense<0.000000e+00> : vector<256x128xf32>
    %18 = tpu.matmul %16, %17, %cst_14 {dimension_numbers = #tpu.dot_dimension_numbers<[1], [0], [0], [1], [0, 0, 1, 1], [], []>} : vector<256x128xbf16>, vector<128x128xbf16>, vector<256x128xf32> -> vector<256x128xf32>
    %c0_15 = arith.constant 0 : index
    %c0_16 = arith.constant 0 : index
    %19 = vector.load %arg8[%c0_15, %c0_16] : memref<1x128xf32, #tpu.memory_space<vmem>>, vector<1x128xf32>
    %20 = vector.broadcast %19 : vector<1x128xf32> to vector<256x128xf32>
    %21 = arith.addf %18, %20 : vector<256x128xf32>
    %22 = arith.truncf %21 : vector<256x128xf32> to vector<256x128xbf16>
    %c0_17 = arith.constant 0 : index
    %c0_18 = arith.constant 0 : index
    %23 = vector.load %arg9[%c0_17, %c0_18] : memref<256x128xbf16, #tpu.memory_space<vmem>>, vector<256x128xbf16>
    tpu.vector_store %arg9[%c0_17, %c0_18], %22 {strides = array<i32>} : memref<256x128xbf16, #tpu.memory_space<vmem>>, vector<256x128xbf16>,
    return
  }
  func.func @transform_0(%arg0: i32, %arg1: i32) -> (i32, i32) {
    %c0_i32 = arith.constant 0 : i32
    %c0_i32_0 = arith.constant 0 : i32
    return %arg0, %c0_i32 : i32, i32
  }
  func.func @transform_1(%arg0: i32, %arg1: i32) -> (i32, i32) {
    %c0_i32 = arith.constant 0 : i32
    %c0_i32_0 = arith.constant 0 : i32
    %c0_i32_1 = arith.constant 0 : i32
    return %c0_i32, %c0_i32_0 : i32, i32
  }
  func.func @transform_2(%arg0: i32, %arg1: i32) -> (i32, i32) {
    %c0_i32 = arith.constant 0 : i32
    %c0_i32_0 = arith.constant 0 : i32
    %c0_i32_1 = arith.constant 0 : i32
    return %c0_i32, %c0_i32_0 : i32, i32
  }
  func.func @transform_3(%arg0: i32, %arg1: i32) -> (i32, i32) {
    %c0_i32 = arith.constant 0 : i32
    %c0_i32_0 = arith.constant 0 : i32
    %c0_i32_1 = arith.constant 0 : i32
    return %c0_i32, %c0_i32_0 : i32, i32
  }
  func.func @transform_4(%arg0: i32, %arg1: i32) -> (i32, i32) {
    %c0_i32 = arith.constant 0 : i32
    %c0_i32_0 = arith.constant 0 : i32
    %c0_i32_1 = arith.constant 0 : i32
    return %c0_i32, %c0_i32_0 : i32, i32
  }
  func.func @transform_5(%arg0: i32, %arg1: i32) -> (i32, i32) {
    %c0_i32 = arith.constant 0 : i32
    %c0_i32_0 = arith.constant 0 : i32
    %c0_i32_1 = arith.constant 0 : i32
    return %c0_i32, %c0_i32_0 : i32, i32
  }
  func.func @transform_6(%arg0: i32, %arg1: i32) -> (i32, i32) {
    %c0_i32 = arith.constant 0 : i32
    %c0_i32_0 = arith.constant 0 : i32
    %c0_i32_1 = arith.constant 0 : i32
    return %c0_i32, %c0_i32_0 : i32, i32
  }
  func.func @transform_7(%arg0: i32, %arg1: i32) -> (i32, i32) {
    %c0_i32 = arith.constant 0 : i32
    %c0_i32_0 = arith.constant 0 : i32
    return %arg0, %c0_i32 : i32, i32
  }
}

</mosaic_0001>

<bundles_post_ra>
// kernel: tpu_custom_call.1
= control target key start
LH: loop header
LB: loop body
LE: loop exit
PB: predicated region body
PF: predicated region fallthrough
CT: control target
= control target key end

     0   :  { %12 = vsyncpa [#allocation3], 0  ;;  %s2489_s0 = inlined_call_operand.hbm [shape: bf16[256,256], index: 0, kind: input, shape index: {}]   ;;  %s2490_s1 = inlined_call_operand.hbm [shape: bf16[256,256], index: 1, kind: input, shape index: {}]   ;;  %s2491_s2 = inlined_call_operand.vmem [shape: f32[1,256], index: 2, kind: input, shape index: {}]   ;;  %s2492_s3 = inlined_call_operand.hbm [shape: bf16[256,128], index: 3, kind: input, shape index: {}]   ;;  %s2493_s4 = inlined_call_operand.vmem [shape: f32[1,128], index: 4, kind: input, shape index: {}]   ;;  %s2494_s5 = inlined_call_operand.hbm [shape: bf16[128,128], index: 5, kind: input, shape index: {}]   ;;  %s2495_s6 = inlined_call_operand.vmem [shape: f32[1,128], index: 6, kind: input, shape index: {}]   ;;  %s2496_s7 = inlined_call_operand.hbm [shape: bf16[256,128], index: 7, kind: output, shape index: {}]  }
   0x1   :  { %13 = vsyncpa [#allocation6], 0 }
   0x2   :  { %14 = vsyncpa [#allocation9], 0 }
   0x3   :  { %15 = vsyncpa [#allocation4], 0  ;;  %s2219_s24 = smov [#allocation5]   ;;  %s2220_s26 = smov [#allocation2]  }
   0x4   :  { %s33_s25 = sshll.u32 %s2219_s24, 4  ;;  %s21_s27 = sshll.u32 %s2220_s26, 4  ;;  %s34_s25 = int_to_ptr.vmem [resolvable:$true] %s33_s25  ;;  %s2268_s27 = int_to_ptr.vmem [resolvable:$true] %s21_s27 }
   0x5   :  { %s2101_s30 = scalar_lea.hbm %s2490_s1, 4096 }
   0x6   :  { %p2102_p0 = scmp.ne.s32.totalorder %s2490_s1, %s2101_s30  ;;  %p2105_p1 = scmp.lt.u32.totalorder %s2101_s30, %s2490_s1 }
   0x8   :  { %p2107_p2 = pnand %p2105_p1, %p2102_p0 }
   0xa   :  { %2110 = shalt.err (!%p2107_p2)
}
   0xb   :  { %s2111_s12 = scalar_lea.vmem %s34_s25, 4096  ;;  %p2116_p4 = scmp.lt.s32.totalorder %s34_s25, %s34_s25 }
   0xc   :  { %p2112_p3 = scmp.ne.s32.totalorder %s34_s25, %s2111_s12  ;;  %p2117_p5 = scmp.lt.s32.totalorder %s2111_s12, %s2111_s12 }
   0xe   :  { %p2118_p6 = por %p2117_p5, %p2116_p4 }
  0x10   :  { %p2119_p7 = pnand %p2118_p6, %p2112_p3 }
  0x12   :  { %2122 = shalt.err (!%p2119_p7)
}
  0x13   :  { %s2221_s13 = smov 128   ;;  %s2222_s14 = smov 8  }
  0x14   :  { %39 = dma.hbm_to_vmem [thread:$0]  %s2490_s1, 4096, %s34_s25, [#allocation6], %s2221_s13, %s2221_s13, %s2222_s14  }
  0x15   :  { %s2123_s19 = scalar_lea.hbm %s2489_s0, 4096 }
  0x16   :  { %p2124_p8 = scmp.ne.s32.totalorder %s2489_s0, %s2123_s19  ;;  %p2127_p9 = scmp.lt.u32.totalorder %s2123_s19, %s2489_s0 }
  0x18   :  { %p2129_p10 = pnand %p2127_p9, %p2124_p8 }
  0x1a   :  { %2132 = shalt.err (!%p2129_p10)
}
  0x1b   :  { %s2133_s24 = scalar_lea.vmem %s2268_s27, 4096  ;;  %p2138_p12 = scmp.lt.s32.totalorder %s2268_s27, %s2268_s27 }
  0x1c   :  { %p2134_p11 = scmp.ne.s32.totalorder %s2268_s27, %s2133_s24  ;;  %p2139_p13 = scmp.lt.s32.totalorder %s2133_s24, %s2133_s24 }
  0x1e   :  { %p2140_p0 = por %p2139_p13, %p2138_p12 }
  0x20   :  { %p2141_p1 = pnand %p2140_p0, %p2134_p11 }
  0x22   :  { %2144 = shalt.err (!%p2141_p1)
}
  0x23   :  { %27 = dma.hbm_to_vmem [thread:$0]  %s2489_s0, 4096, %s2268_s27, [#allocation3], %s2221_s13, %s2221_s13, %s2222_s14  }
  0x24   :  { %s2223_s26 = smov [#allocation7]   ;;  %s2145_s8 = scalar_lea.hbm %s2492_s3, 2048 }
  0x25   :  { %s47_s28 = sshll.u32 %s2223_s26, 4  ;;  %p2146_p2 = scmp.ne.s32.totalorder %s2492_s3, %s2145_s8  ;;  %s48_s28 = int_to_ptr.vmem [resolvable:$true] %s47_s28 }
  0x26   :  { %p2149_p3 = scmp.lt.u32.totalorder %s2145_s8, %s2492_s3 }
  0x28   :  { %p2151_p4 = pnand %p2149_p3, %p2146_p2 }
  0x2a   :  { %2154 = shalt.err (!%p2151_p4)
}
  0x2b   :  { %s2155_s15 = scalar_lea.vmem %s48_s28, 2048  ;;  %p2160_p6 = scmp.lt.s32.totalorder %s48_s28, %s48_s28 }
  0x2c   :  { %p2156_p5 = scmp.ne.s32.totalorder %s48_s28, %s2155_s15  ;;  %p2161_p7 = scmp.lt.s32.totalorder %s2155_s15, %s2155_s15 }
  0x2e   :  { %p2162_p8 = por %p2161_p7, %p2160_p6 }
  0x30   :  { %p2163_p9 = pnand %p2162_p8, %p2156_p5 }
  0x32   :  { %2166 = shalt.err (!%p2163_p9)
}
  0x33   :  { %s2224_s0 = smov 64   ;;  %s2225_s27 = smov 4  }
  0x34   :  { %53 = dma.hbm_to_vmem [thread:$0]  %s2492_s3, 2048, %s48_s28, [#allocation6], %s2224_s0, %s2224_s0, %s2225_s27  }
  0x35   :  { %s2226_s16 = smov [#allocation8]   ;;  %s2167_s20 = scalar_lea.hbm %s2494_s5, 1024 }
  0x36   :  { %s61_s17 = sshll.u32 %s2226_s16, 4  ;;  %p2168_p10 = scmp.ne.s32.totalorder %s2494_s5, %s2167_s20  ;;  %s62_s17 = int_to_ptr.vmem [resolvable:$true] %s61_s17 }
  0x37   :  { %p2171_p11 = scmp.lt.u32.totalorder %s2167_s20, %s2494_s5 }
  0x39   :  { %p2173_p12 = pnand %p2171_p11, %p2168_p10 }
  0x3b   :  { %2176 = shalt.err (!%p2173_p12)
}
  0x3c   :  { %s2177_s1 = scalar_lea.vmem %s62_s17, 1024  ;;  %p2182_p0 = scmp.lt.s32.totalorder %s62_s17, %s62_s17 }
  0x3d   :  { %p2178_p13 = scmp.ne.s32.totalorder %s62_s17, %s2177_s1  ;;  %p2183_p1 = scmp.lt.s32.totalorder %s2177_s1, %s2177_s1 }
  0x3f   :  { %p2184_p2 = por %p2183_p1, %p2182_p0 }
  0x41   :  { %p2185_p3 = pnand %p2184_p2, %p2178_p13 }
  0x43   :  { %2188 = shalt.err (!%p2185_p3)
}
  0x44   :  { %67 = dma.hbm_to_vmem [thread:$0]  %s2494_s5, 1024, %s62_s17, [#allocation9], %s2224_s0, %s2224_s0, %s2225_s27  }
  0x45   :  { %2211 = dma.done.wait [#allocation3], 4096  }
  0x46   :  { %2212 = vsyncadd [#allocation3], 4294963200 }
  0x47   :  { %2213 = dma.done.wait [#allocation6], 6144  }
  0x48   :  { %2214 = vsyncadd [#allocation6], 4294961152 }
  0x49   :  { %2215 = dma.done.wait [#allocation9], 1024  }
  0x4a   :  { %2216 = vsyncadd [#allocation9], 4294966272  ;;  %v1981_v0 = vld [vmem:[#allocation5 + $0x4] ss:$8 sps:$4 sm:$0xff]   ;;  %v1983_v1 = vld [vmem:[#allocation5] ss:$8 sps:$4 sm:$0xff]  }
  0x4b   :  { %479 = vmatprep.subr.bf16.mxu0 %v1981_v0  ;;  %v1984_v2 = vld [vmem:[#allocation5 + $0x14] ss:$8 sps:$4 sm:$0xff]   ;;  %v1986_v3 = vld [vmem:[#allocation5 + $0x10] ss:$8 sps:$4 sm:$0xff]   ;;  %v1987_v4 = vld [vmem:[#allocation5 + $0x24] ss:$8 sps:$4 sm:$0xff]  }
  0x4c   :  { %480 = vmatpush1.bf16.msra.mxu0 %v1983_v1  ;;  %v1989_v5 = vld [vmem:[#allocation5 + $0x20] ss:$8 sps:$4 sm:$0xff]   ;;  %v1990_v6 = vld [vmem:[#allocation5 + $0x34] ss:$8 sps:$4 sm:$0xff]   ;;  %v1992_v7 = vld [vmem:[#allocation5 + $0x30] ss:$8 sps:$4 sm:$0xff]  }
  0x4d   :  { %481 = vmatprep.subr.bf16.mxu0 %v1984_v2  ;;  %v1993_v8 = vld [vmem:[#allocation5 + $0x44] ss:$8 sps:$4 sm:$0xff]   ;;  %v1995_v9 = vld [vmem:[#allocation5 + $0x40] ss:$8 sps:$4 sm:$0xff]   ;;  %v1996_v10 = vld [vmem:[#allocation5 + $0x54] ss:$8 sps:$4 sm:$0xff]  }
  0x4e   :  { %v1998_v11 = vld [vmem:[#allocation5 + $0x50] ss:$8 sps:$4 sm:$0xff]   ;;  %v1999_v12 = vld [vmem:[#allocation5 + $0x64] ss:$8 sps:$4 sm:$0xff]   ;;  %v2001_v14 = vld [vmem:[#allocation5 + $0x60] ss:$8 sps:$4 sm:$0xff]  }
  0x4f   :  { %v2031_v13 = vld [vmem:[#allocation2 + $0x4] ss:$8 sps:$4 sm:$0xff]   ;;  %v2002_v15 = vld [vmem:[#allocation5 + $0x74] ss:$8 sps:$4 sm:$0xff]   ;;  %v2004_v16 = vld [vmem:[#allocation5 + $0x70] ss:$8 sps:$4 sm:$0xff]  }
  0x50   :  { %482 = vmatpush1.bf16.msra.mxu0 %v1986_v3  ;;  %511 = vmatprep.mubr.bf16.mxu0 %v2031_v13  ;;  %v2005_v17 = vld [vmem:[#allocation5 + $0x84] ss:$8 sps:$4 sm:$0xff]   ;;  %v2007_v18 = vld [vmem:[#allocation5 + $0x80] ss:$8 sps:$4 sm:$0xff]   ;;  %v2008_v19 = vld [vmem:[#allocation5 + $0x94] ss:$8 sps:$4 sm:$0xff]  }
  0x51   :  { %483 = vmatprep.subr.bf16.mxu0 %v1987_v4  ;;  %v2010_v20 = vld [vmem:[#allocation5 + $0x90] ss:$8 sps:$4 sm:$0xff]   ;;  %v2011_v21 = vld [vmem:[#allocation5 + $0xa4] ss:$8 sps:$4 sm:$0xff]   ;;  %v2013_v22 = vld [vmem:[#allocation5 + $0xa0] ss:$8 sps:$4 sm:$0xff]  }
  0x52   :  { %v2014_v23 = vld [vmem:[#allocation5 + $0xb4] ss:$8 sps:$4 sm:$0xff]   ;;  %v2016_v24 = vld [vmem:[#allocation5 + $0xb0] ss:$8 sps:$4 sm:$0xff]   ;;  %v2017_v25 = vld [vmem:[#allocation5 + $0xc4] ss:$8 sps:$4 sm:$0xff]  }
  0x53   :  { %v2019_v26 = vld [vmem:[#allocation5 + $0xc0] ss:$8 sps:$4 sm:$0xff]   ;;  %v2020_v27 = vld [vmem:[#allocation5 + $0xd4] ss:$8 sps:$4 sm:$0xff]   ;;  %v2022_v28 = vld [vmem:[#allocation5 + $0xd0] ss:$8 sps:$4 sm:$0xff]  }
  0x54   :  { %484 = vmatpush1.bf16.msra.mxu0 %v1989_v5  ;;  %v2023_v29 = vld [vmem:[#allocation5 + $0xe4] ss:$8 sps:$4 sm:$0xff]   ;;  %v2025_v30 = vld [vmem:[#allocation5 + $0xe0] ss:$8 sps:$4 sm:$0xff]   ;;  %v2026_v31 = vld [vmem:[#allocation5 + $0xf4] ss:$8 sps:$4 sm:$0xff]  }
  0x55   :  { %485 = vmatprep.subr.bf16.mxu0 %v1990_v6  ;;  %v2077_v32 = vld [vmem:[#allocation7 + $0x40] sm:$0xff]   ;;  %v2028_v33 = vld [vmem:[#allocation5 + $0xf0] ss:$8 sps:$4 sm:$0xff]   ;;  %v2079_v35 = vld [vmem:[#allocation7 + $0x48] sm:$0xff]  }
  0x56   :  { %v2078_v34 = vld [vmem:[#allocation7] sm:$0xff]   ;;  %1956 = vmatprep.subr.bf16.mxu1 %v2077_v32  ;;  %v2032_v37 = vld [vmem:[#allocation2 + $0x14] ss:$8 sps:$4 sm:$0xff]   ;;  %v2080_v38 = vld [vmem:[#allocation7 + $0x8] sm:$0xff]  }
  0x57   :  { %1964 = vmatpush3.bf16.msra.mxu1 %v2078_v34  ;;  %v2029_v36 = vld [vmem:[#allocation2] ss:$8 sps:$4 sm:$0xff]   ;;  %v2081_v39 = vld [vmem:[#allocation7 + $0x50] sm:$0xff]   ;;  %v2083_v41 = vld [vmem:[#allocation7 + $0x58] sm:$0xff]  }
  0x58   :  { %486 = vmatpush1.bf16.msra.mxu0 %v1992_v7  ;;  %1957 = vmatprep.subr.bf16.mxu1 %v2079_v35  ;;  %v2082_v40 = vld [vmem:[#allocation7 + $0x10] sm:$0xff]   ;;  %v2035_v43 = vld [vmem:[#allocation2 + $0x24] ss:$8 sps:$4 sm:$0xff]   ;;  %v2084_v44 = vld [vmem:[#allocation7 + $0x18] sm:$0xff]  }
  0x59   :  { %487 = vmatprep.subr.bf16.mxu0 %v1993_v8  ;;  %v2034_v42 = vld [vmem:[#allocation2 + $0x10] ss:$8 sps:$4 sm:$0xff]   ;;  %v2085_v45 = vld [vmem:[#allocation7 + $0x60] sm:$0xff]   ;;  %v2087_v47 = vld [vmem:[#allocation7 + $0x68] sm:$0xff]  }
  0x5a   :  { %v2086_v46 = vld [vmem:[#allocation7 + $0x20] sm:$0xff]   ;;  %v2038_v49 = vld [vmem:[#allocation2 + $0x34] ss:$8 sps:$4 sm:$0xff]   ;;  %v2040_v50 = vld [vmem:[#allocation2 + $0x30] ss:$8 sps:$4 sm:$0xff]  }
  0x5b   :  { %1965 = vmatpush3.bf16.msra.mxu1 %v2080_v38  ;;  %v2037_v48 = vld [vmem:[#allocation2 + $0x20] ss:$8 sps:$4 sm:$0xff]   ;;  %v2041_v51 = vld [vmem:[#allocation2 + $0x44] ss:$8 sps:$4 sm:$0xff]   ;;  %v2044_v53 = vld [vmem:[#allocation2 + $0x54] ss:$8 sps:$4 sm:$0xff]  }
  0x5c   :  { %488 = vmatpush1.bf16.msra.mxu0 %v1995_v9  ;;  %1958 = vmatprep.subr.bf16.mxu1 %v2081_v39  ;;  %v2043_v52 = vld [vmem:[#allocation2 + $0x40] ss:$8 sps:$4 sm:$0xff]   ;;  %v2046_v54 = vld [vmem:[#allocation2 + $0x50] ss:$8 sps:$4 sm:$0xff]   ;;  %v2047_v55 = vld [vmem:[#allocation2 + $0x64] ss:$8 sps:$4 sm:$0xff]  }
  0x5d   :  { %489 = vmatprep.subr.bf16.mxu0 %v1996_v10  ;;  %v2049_v56 = vld [vmem:[#allocation2 + $0x60] ss:$8 sps:$4 sm:$0xff]   ;;  %v2050_v57 = vld [vmem:[#allocation2 + $0x74] ss:$8 sps:$4 sm:$0xff]   ;;  %v2052_v58 = vld [vmem:[#allocation2 + $0x70] ss:$8 sps:$4 sm:$0xff]  }
  0x5e   :  { %v2053_v59 = vld [vmem:[#allocation2 + $0x84] ss:$8 sps:$4 sm:$0xff]   ;;  %v2055_v60 = vld [vmem:[#allocation2 + $0x80] ss:$8 sps:$4 sm:$0xff]   ;;  %v2056_v61 = vld [vmem:[#allocation2 + $0x94] ss:$8 sps:$4 sm:$0xff]  }
  0x5f   :  { %1966 = vmatpush3.bf16.msra.mxu1 %v2082_v40  ;;  %v2058_v62 = vld [vmem:[#allocation2 + $0x90] ss:$8 sps:$4 sm:$0xff]   ;;  %v2059_v63 = vld [vmem:[#allocation2 + $0xa4] ss:$8 sps:$4 sm:$0xff]   ;;  %v2061_v0 = vld [vmem:[#allocation2 + $0xa0] ss:$8 sps:$4 sm:$0xff]  }
  0x60   :  { %490 = vmatpush1.bf16.msra.mxu0 %v1998_v11  ;;  %1959 = vmatprep.subr.bf16.mxu1 %v2083_v41  ;;  %v2062_v1 = vld [vmem:[#allocation2 + $0xb4] ss:$8 sps:$4 sm:$0xff]   ;;  %v2088_v2 = vld [vmem:[#allocation7 + $0x28] sm:$0xff]   ;;  %v2064_v3 = vld [vmem:[#allocation2 + $0xb0] ss:$8 sps:$4 sm:$0xff]  }
  0x61   :  { %491 = vmatprep.subr.bf16.mxu0 %v1999_v12  ;;  %v2089_v4 = vld [vmem:[#allocation7 + $0x70] sm:$0xff]   ;;  %v2065_v5 = vld [vmem:[#allocation2 + $0xc4] ss:$8 sps:$4 sm:$0xff]   ;;  %v2091_v7 = vld [vmem:[#allocation7 + $0x78] sm:$0xff]  }
  0x62   :  { %v2090_v6 = vld [vmem:[#allocation7 + $0x30] sm:$0xff]   ;;  %v2092_v8 = vld [vmem:[#allocation7 + $0x38] sm:$0xff]   ;;  %v2067_v9 = vld [vmem:[#allocation2 + $0xc0] ss:$8 sps:$4 sm:$0xff]  }
  0x63   :  { %1967 = vmatpush3.bf16.msra.mxu1 %v2084_v44  ;;  %v2068_v10 = vld [vmem:[#allocation2 + $0xd4] ss:$8 sps:$4 sm:$0xff]   ;;  %v2070_v11 = vld [vmem:[#allocation2 + $0xd0] ss:$8 sps:$4 sm:$0xff]   ;;  %v2071_v12 = vld [vmem:[#allocation2 + $0xe4] ss:$8 sps:$4 sm:$0xff]  }
  0x64   :  { %492 = vmatpush1.bf16.msra.mxu0 %v2001_v14  ;;  %1960 = vmatprep.subr.bf16.mxu1 %v2085_v45  ;;  %v2073_v13 = vld [vmem:[#allocation2 + $0xe0] ss:$8 sps:$4 sm:$0xff]   ;;  %v2074_v14 = vld [vmem:[#allocation2 + $0xf4] ss:$8 sps:$4 sm:$0xff]  }
  0x65   :  { %493 = vmatprep.subr.bf16.mxu0 %v2002_v15  ;;  %v2076_v15 = vld [vmem:[#allocation2 + $0xf0] ss:$8 sps:$4 sm:$0xff]  }
  0x67   :  { %1968 = vmatpush3.bf16.msra.mxu1 %v2086_v46 }
  0x68   :  { %494 = vmatpush1.bf16.msra.mxu0 %v2004_v16  ;;  %1961 = vmatprep.subr.bf16.mxu1 %v2087_v47  ;;  %v149_v16 = vlaneseq }
  0x69   :  { %495 = vmatprep.subr.bf16.mxu0 %v2005_v17 }
  0x6a   :  { %v150_v17 = vshrl.u32 %v149_v16, 7 }
  0x6b   :  { %1969 = vmatpush3.bf16.msra.mxu1 %v2088_v2 }
  0x6c   :  { %496 = vmatpush1.bf16.msra.mxu0 %v2007_v18  ;;  %1962 = vmatprep.subr.bf16.mxu1 %v2089_v4  ;;  %v151_v18 = vsub.s32 0, %v150_v17 }
  0x6d   :  { %497 = vmatprep.subr.bf16.mxu0 %v2008_v19  ;;  %v147_v19 = vld [vmem:[%s2491_s2] sm:$0x3] }
  0x6f   :  { %1970 = vmatpush3.bf16.msra.mxu1 %v2090_v6 }
  0x70   :  { %498 = vmatpush1.bf16.msra.mxu0 %v2010_v20  ;;  %1963 = vmatprep.subr.bf16.mxu1 %v2091_v7  ;;  %v155_v20 = vsub.s32 1, %v150_v17 }
  0x71   :  { %499 = vmatprep.subr.bf16.mxu0 %v2011_v21  ;;  %v2332_v21 = vrot.slane %v147_v19, %v151_v18 }
  0x73   :  { %1971 = vmatpush3.bf16.msra.mxu1 %v2092_v8 }
  0x74   :  { %500 = vmatpush1.bf16.msra.mxu0 %v2013_v22  ;;  %v2334_v22 = vrot.slane %v147_v19, %v155_v20 }
  0x75   :  { %501 = vmatprep.subr.bf16.mxu0 %v2014_v23 }
  0x78   :  { %502 = vmatpush1.bf16.msra.mxu0 %v2016_v24 }
  0x79   :  { %503 = vmatprep.subr.bf16.mxu0 %v2017_v25 }
  0x7c   :  { %504 = vmatpush1.bf16.msra.mxu0 %v2019_v26 }
  0x7d   :  { %505 = vmatprep.subr.bf16.mxu0 %v2020_v27 }
  0x80   :  { %506 = vmatpush1.bf16.msra.mxu0 %v2022_v28 }
  0x81   :  { %507 = vmatprep.subr.bf16.mxu0 %v2023_v29 }
  0x84   :  { %508 = vmatpush1.bf16.msra.mxu0 %v2025_v30  ;;  %v2093_v30 = vld [vmem:[#allocation8] sm:$0xff]  }
  0x85   :  { %509 = vmatprep.subr.bf16.mxu0 %v2026_v31  ;;  %1908 = vmatprep.subr.bf16.mxu1 %v2093_v30 }
  0x88   :  { %510 = vmatpush1.bf16.msra.mxu0 %v2028_v33 }
  0x89   :  { %1772 = vmatprep.subr.bf16.mxu0 %v2077_v32 }
  0x8b   :  { %512 = vmatmul.mubr.bf16.vlgmr.msra.gmra.mrb[0].mxu0 %v2029_v36 }
  0x8c   :  { %521 = vmatprep.mubr.bf16.mxu0 %v2032_v37  ;;  %1773 = vmatpush3.bf16.msra.mxu0 %v2078_v34 }
  0x8d   :  { %1774 = vmatprep.subr.bf16.mxu0 %v2079_v35 }
  0x90   :  { %1775 = vmatpush3.bf16.msra.mxu0 %v2080_v38 }
  0x91   :  { %1776 = vmatprep.subr.bf16.mxu0 %v2081_v39 }
  0x93   :  { %522 = vmatmul.mubr.bf16.gmra.mrb[4].mxu0 %v2034_v42 }
  0x94   :  { %531 = vmatprep.mubr.bf16.mxu0 %v2035_v43  ;;  %1777 = vmatpush3.bf16.msra.mxu0 %v2082_v40 }
  0x95   :  { %1778 = vmatprep.subr.bf16.mxu0 %v2083_v41 }
  0x98   :  { %1779 = vmatpush3.bf16.msra.mxu0 %v2084_v44 }
  0x99   :  { %1780 = vmatprep.subr.bf16.mxu0 %v2085_v45 }
  0x9b   :  { %532 = vmatmul.mubr.bf16.gmra.mrb[8].mxu0 %v2037_v48 }
  0x9c   :  { %541 = vmatprep.mubr.bf16.mxu0 %v2038_v49  ;;  %1781 = vmatpush3.bf16.msra.mxu0 %v2086_v46 }
  0x9d   :  { %1782 = vmatprep.subr.bf16.mxu0 %v2087_v47 }
  0xa0   :  { %1783 = vmatpush3.bf16.msra.mxu0 %v2088_v2 }
  0xa1   :  { %1784 = vmatprep.subr.bf16.mxu0 %v2089_v4 }
  0xa3   :  { %542 = vmatmul.mubr.bf16.gmra.mrb[12].mxu0 %v2040_v50 }
  0xa4   :  { %551 = vmatprep.mubr.bf16.mxu0 %v2041_v51  ;;  %1785 = vmatpush3.bf16.msra.mxu0 %v2090_v6 }
  0xa5   :  { %1786 = vmatprep.subr.bf16.mxu0 %v2091_v7 }
  0xa8   :  { %1787 = vmatpush3.bf16.msra.mxu0 %v2092_v8 }
  0xab   :  { %552 = vmatmul.mubr.bf16.gmra.mrb[16].mxu0 %v2043_v52 }
  0xac   :  { %561 = vmatprep.mubr.bf16.mxu0 %v2044_v53 }
  0xb3   :  { %562 = vmatmul.mubr.bf16.gmra.mrb[20].mxu0 %v2046_v54 }
  0xb4   :  { %571 = vmatprep.mubr.bf16.mxu0 %v2047_v55 }
  0xbb   :  { %572 = vmatmul.mubr.bf16.gmra.mrb[24].mxu0 %v2049_v56 }
  0xbc   :  { %581 = vmatprep.mubr.bf16.mxu0 %v2050_v57 }
  0xc3   :  { %582 = vmatmul.mubr.bf16.gmra.mrb[28].mxu0 %v2052_v58 }
  0xc4   :  { %591 = vmatprep.mubr.bf16.mxu0 %v2053_v59 }
  0xcb   :  { %592 = vmatmul.mubr.bf16.gmra.mrb[32].mxu0 %v2055_v60 }
  0xcc   :  { %601 = vmatprep.mubr.bf16.mxu0 %v2056_v61 }
  0xd3   :  { %602 = vmatmul.mubr.bf16.gmra.mrb[36].mxu0 %v2058_v62 }
  0xd4   :  { %611 = vmatprep.mubr.bf16.mxu0 %v2059_v63 }
  0xdb   :  { %612 = vmatmul.mubr.bf16.gmra.mrb[40].mxu0 %v2061_v0 }
  0xdc   :  { %621 = vmatprep.mubr.bf16.mxu0 %v2062_v1 }
  0xe3   :  { %622 = vmatmul.mubr.bf16.gmra.mrb[44].mxu0 %v2064_v3 }
  0xe4   :  { %631 = vmatprep.mubr.bf16.mxu0 %v2065_v5  ;;  %v2094_v5 = vld [vmem:[#allocation8 + $0x8] sm:$0xff]  }
  0xeb   :  { %632 = vmatmul.mubr.bf16.gmra.mrb[48].mxu0 %v2067_v9 }
  0xec   :  { %641 = vmatprep.mubr.bf16.mxu0 %v2068_v10 }
  0xf3   :  { %642 = vmatmul.mubr.bf16.gmra.mrb[52].mxu0 %v2070_v11 }
  0xf4   :  { %651 = vmatprep.mubr.bf16.mxu0 %v2071_v12 }
  0xfb   :  { %652 = vmatmul.mubr.bf16.gmra.mrb[56].mxu0 %v2073_v13  ;;  %v2095_v13 = vld [vmem:[#allocation8 + $0x10] sm:$0xff]  }
  0xfc   :  { %661 = vmatprep.mubr.bf16.mxu0 %v2074_v14 }
 0x103   :  { %662 = vmatmul.mubr.bf16.gmra.mrb[60].mxu0 %v2076_v15 }
 0x15e   :  { %v513_v23 = vpop.f32.mrb[0].mxu0 }
 0x15f   :  { %v514_v24 = vadd.f32 %v513_v23, %v2332_v21  ;;  %v515_v25 = vpop.f32.mrb[1].mxu0 }
 0x160   :  { %v516_v26 = vadd.f32 %v515_v25, %v2334_v22  ;;  %v517_v27 = vpop.f32.mrb[2].mxu0 }
 0x161   :  { %v518_v28 = vadd.f32 %v517_v27, %v2332_v21  ;;  %v519_v29 = vpop.f32.mrb[3].mxu0  ;;  %v672_v32 = vmax.f32 %v514_v24, 0.0 }
 0x162   :  { %v520_v31 = vadd.f32 %v519_v29, %v2334_v22  ;;  %v673_v34 = vmax.f32 %v516_v26, 0.0 }
 0x163   :  { %v674_v33 = vmax.f32 %v518_v28, 0.0 }
 0x164   :  { %v675_v35 = vmax.f32 %v520_v31, 0.0 }
 0x165   :  { %v736_v36 = vpack.c.bf16 %v674_v33, %v672_v32 }
 0x166   :  { %v737_v37 = vpack.c.bf16 %v675_v35, %v673_v34  ;;  %v523_v38 = vpop.f32.mrb[4].mxu0 }
 0x167   :  { %v524_v39 = vadd.f32 %v523_v38, %v2332_v21  ;;  %v525_v40 = vpop.f32.mrb[5].mxu0 }
 0x168   :  { %v526_v41 = vadd.f32 %v525_v40, %v2334_v22  ;;  %v527_v42 = vpop.f32.mrb[6].mxu0  ;;  %935 = vmatprep.mubr.bf16.mxu0 %v737_v37 }
 0x169   :  { %v528_v43 = vadd.f32 %v527_v42, %v2332_v21  ;;  %v529_v44 = vpop.f32.mrb[7].mxu0  ;;  %936 = vmatmul.mubr.bf16.vlgmr.msra.gmra.mrb[64].mxu0 %v736_v36  ;;  %v676_v46 = vmax.f32 %v524_v39, 0.0 }
 0x16a   :  { %v530_v45 = vadd.f32 %v529_v44, %v2334_v22  ;;  %v677_v48 = vmax.f32 %v526_v41, 0.0 }
 0x16b   :  { %v678_v47 = vmax.f32 %v528_v43, 0.0 }
 0x16c   :  { %v679_v49 = vmax.f32 %v530_v45, 0.0 }
 0x16d   :  { %v738_v50 = vpack.c.bf16 %v678_v47, %v676_v46 }
 0x16e   :  { %v739_v51 = vpack.c.bf16 %v679_v49, %v677_v48  ;;  %v533_v52 = vpop.f32.mrb[8].mxu0 }
 0x16f   :  { %v534_v53 = vadd.f32 %v533_v52, %v2332_v21  ;;  %v535_v54 = vpop.f32.mrb[9].mxu0 }
 0x170   :  { %v536_v55 = vadd.f32 %v535_v54, %v2334_v22  ;;  %v537_v56 = vpop.f32.mrb[10].mxu0  ;;  %943 = vmatprep.mubr.bf16.mxu0 %v739_v51 }
 0x171   :  { %v538_v57 = vadd.f32 %v537_v56, %v2332_v21  ;;  %v539_v58 = vpop.f32.mrb[11].mxu0  ;;  %944 = vmatmul.mubr.bf16.gmra.mrb[68].mxu0 %v738_v50  ;;  %v680_v60 = vmax.f32 %v534_v53, 0.0 }
 0x172   :  { %v540_v59 = vadd.f32 %v539_v58, %v2334_v22  ;;  %v681_v62 = vmax.f32 %v536_v55, 0.0 }
 0x173   :  { %v682_v61 = vmax.f32 %v538_v57, 0.0 }
 0x174   :  { %v683_v63 = vmax.f32 %v540_v59, 0.0 }
 0x175   :  { %v740_v0 = vpack.c.bf16 %v682_v61, %v680_v60 }
 0x176   :  { %v543_v1 = vpop.f32.mrb[12].mxu0  ;;  %v741_v2 = vpack.c.bf16 %v683_v63, %v681_v62 }
 0x177   :  { %v544_v3 = vadd.f32 %v543_v1, %v2332_v21  ;;  %v545_v4 = vpop.f32.mrb[13].mxu0 }
 0x178   :  { %v546_v6 = vadd.f32 %v545_v4, %v2334_v22  ;;  %v547_v7 = vpop.f32.mrb[14].mxu0  ;;  %951 = vmatprep.mubr.bf16.mxu1 %v741_v2 }
 0x179   :  { %v548_v8 = vadd.f32 %v547_v7, %v2332_v21  ;;  %v549_v9 = vpop.f32.mrb[15].mxu0  ;;  %952 = vmatmul.mubr.bf16.vlgmr.msra.gmra.mrb[0].mxu1 %v740_v0  ;;  %v684_v11 = vmax.f32 %v544_v3, 0.0 }
 0x17a   :  { %v550_v10 = vadd.f32 %v549_v9, %v2334_v22  ;;  %1909 = vmatpush3.bf16.msra.mxu1 %v2093_v30  ;;  %v685_v14 = vmax.f32 %v546_v6, 0.0 }
 0x17b   :  { %v686_v12 = vmax.f32 %v548_v8, 0.0  ;;  %1910 = vmatprep.subr.bf16.mxu1 %v2094_v5 }
 0x17c   :  { %v687_v15 = vmax.f32 %v550_v10, 0.0 }
 0x17d   :  { %v742_v16 = vpack.c.bf16 %v686_v12, %v684_v11 }
 0x17e   :  { %v743_v17 = vpack.c.bf16 %v687_v15, %v685_v14  ;;  %v553_v18 = vpop.f32.mrb[16].mxu0  ;;  %1911 = vmatpush3.bf16.msra.mxu1 %v2094_v5 }
 0x17f   :  { %v554_v19 = vadd.f32 %v553_v18, %v2332_v21  ;;  %v555_v20 = vpop.f32.mrb[17].mxu0  ;;  %1912 = vmatprep.subr.bf16.mxu1 %v2095_v13 }
 0x180   :  { %v556_v23 = vadd.f32 %v555_v20, %v2334_v22  ;;  %v557_v24 = vpop.f32.mrb[18].mxu0  ;;  %959 = vmatprep.mubr.bf16.mxu1 %v743_v17 }
 0x181   :  { %v558_v25 = vadd.f32 %v557_v24, %v2332_v21  ;;  %v559_v26 = vpop.f32.mrb[19].mxu0  ;;  %960 = vmatmul.mubr.bf16.gmra.mrb[4].mxu1 %v742_v16  ;;  %v688_v28 = vmax.f32 %v554_v19, 0.0 }
 0x182   :  { %v560_v27 = vadd.f32 %v559_v26, %v2334_v22  ;;  %1913 = vmatpush3.bf16.msra.mxu1 %v2095_v13  ;;  %v689_v30 = vmax.f32 %v556_v23, 0.0 }
 0x183   :  { %v690_v29 = vmax.f32 %v558_v25, 0.0 }
 0x184   :  { %v691_v31 = vmax.f32 %v560_v27, 0.0 }
 0x185   :  { %v744_v32 = vpack.c.bf16 %v690_v29, %v688_v28 }
 0x186   :  { %v745_v33 = vpack.c.bf16 %v691_v31, %v689_v30  ;;  %v563_v34 = vpop.f32.mrb[20].mxu0 }
 0x187   :  { %v564_v35 = vadd.f32 %v563_v34, %v2332_v21  ;;  %v565_v36 = vpop.f32.mrb[21].mxu0 }
 0x188   :  { %v566_v37 = vadd.f32 %v565_v36, %v2334_v22  ;;  %v567_v38 = vpop.f32.mrb[22].mxu0  ;;  %967 = vmatprep.mubr.bf16.mxu1 %v745_v33 }
 0x189   :  { %v568_v39 = vadd.f32 %v567_v38, %v2332_v21  ;;  %v569_v40 = vpop.f32.mrb[23].mxu0  ;;  %968 = vmatmul.mubr.bf16.gmra.mrb[8].mxu1 %v744_v32  ;;  %v692_v42 = vmax.f32 %v564_v35, 0.0 }
 0x18a   :  { %v570_v41 = vadd.f32 %v569_v40, %v2334_v22  ;;  %v693_v44 = vmax.f32 %v566_v37, 0.0 }
 0x18b   :  { %v694_v43 = vmax.f32 %v568_v39, 0.0 }
 0x18c   :  { %v695_v45 = vmax.f32 %v570_v41, 0.0 }
 0x18d   :  { %v746_v46 = vpack.c.bf16 %v694_v43, %v692_v42 }
 0x18e   :  { %v747_v47 = vpack.c.bf16 %v695_v45, %v693_v44  ;;  %v573_v48 = vpop.f32.mrb[24].mxu0 }
 0x18f   :  { %v574_v49 = vadd.f32 %v573_v48, %v2332_v21  ;;  %v575_v50 = vpop.f32.mrb[25].mxu0 }
 0x190   :  { %v576_v51 = vadd.f32 %v575_v50, %v2334_v22  ;;  %v577_v52 = vpop.f32.mrb[26].mxu0  ;;  %975 = vmatprep.mubr.bf16.mxu1 %v747_v47 }
 0x191   :  { %v578_v53 = vadd.f32 %v577_v52, %v2332_v21  ;;  %v579_v54 = vpop.f32.mrb[27].mxu0  ;;  %976 = vmatmul.mubr.bf16.gmra.mrb[12].mxu1 %v746_v46  ;;  %v696_v56 = vmax.f32 %v574_v49, 0.0 }
 0x192   :  { %v580_v55 = vadd.f32 %v579_v54, %v2334_v22  ;;  %v697_v58 = vmax.f32 %v576_v51, 0.0 }
 0x193   :  { %v698_v57 = vmax.f32 %v578_v53, 0.0 }
 0x194   :  { %v699_v59 = vmax.f32 %v580_v55, 0.0 }
 0x195   :  { %v748_v60 = vpack.c.bf16 %v698_v57, %v696_v56 }
 0x196   :  { %v749_v61 = vpack.c.bf16 %v699_v59, %v697_v58  ;;  %v583_v62 = vpop.f32.mrb[28].mxu0 }
 0x197   :  { %v584_v63 = vadd.f32 %v583_v62, %v2332_v21  ;;  %v585_v0 = vpop.f32.mrb[29].mxu0 }
 0x198   :  { %v586_v1 = vadd.f32 %v585_v0, %v2334_v22  ;;  %v587_v2 = vpop.f32.mrb[30].mxu0  ;;  %983 = vmatprep.mubr.bf16.mxu1 %v749_v61  ;;  %v2096_v0 = vld [vmem:[#allocation8 + $0x18] sm:$0xff]  }
 0x199   :  { %v588_v3 = vadd.f32 %v587_v2, %v2332_v21  ;;  %v589_v4 = vpop.f32.mrb[31].mxu0  ;;  %984 = vmatmul.mubr.bf16.gmra.mrb[16].mxu1 %v748_v60  ;;  %v700_v6 = vmax.f32 %v584_v63, 0.0  ;;  %1914 = vmatprep.subr.bf16.mxu1 %v2096_v0 }
 0x19a   :  { %v590_v5 = vadd.f32 %v589_v4, %v2334_v22  ;;  %v701_v8 = vmax.f32 %v586_v1, 0.0  ;;  %1915 = vmatpush3.bf16.msra.mxu1 %v2096_v0 }
 0x19b   :  { %v702_v7 = vmax.f32 %v588_v3, 0.0 }
 0x19c   :  { %v703_v9 = vmax.f32 %v590_v5, 0.0 }
 0x19d   :  { %v750_v10 = vpack.c.bf16 %v702_v7, %v700_v6 }
 0x19e   :  { %v751_v11 = vpack.c.bf16 %v703_v9, %v701_v8  ;;  %v593_v12 = vpop.f32.mrb[32].mxu0  ;;  %v2097_v8 = vld [vmem:[#allocation8 + $0x20] sm:$0xff]  }
 0x19f   :  { %v594_v13 = vadd.f32 %v593_v12, %v2332_v21  ;;  %v595_v14 = vpop.f32.mrb[33].mxu0  ;;  %1916 = vmatprep.subr.bf16.mxu1 %v2097_v8 }
 0x1a0   :  { %v596_v15 = vadd.f32 %v595_v14, %v2334_v22  ;;  %v597_v16 = vpop.f32.mrb[34].mxu0  ;;  %991 = vmatprep.mubr.bf16.mxu1 %v751_v11  ;;  %1917 = vmatpush3.bf16.msra.mxu1 %v2097_v8 }
 0x1a1   :  { %v598_v17 = vadd.f32 %v597_v16, %v2332_v21  ;;  %v599_v18 = vpop.f32.mrb[35].mxu0  ;;  %992 = vmatmul.mubr.bf16.gmra.mrb[20].mxu1 %v750_v10  ;;  %v704_v20 = vmax.f32 %v594_v13, 0.0  ;;  %v2098_v16 = vld [vmem:[#allocation8 + $0x28] sm:$0xff]  }
 0x1a2   :  { %v600_v19 = vadd.f32 %v599_v18, %v2334_v22  ;;  %v705_v24 = vmax.f32 %v596_v15, 0.0  ;;  %1918 = vmatprep.subr.bf16.mxu1 %v2098_v16 }
 0x1a3   :  { %v706_v23 = vmax.f32 %v598_v17, 0.0 }
 0x1a4   :  { %v707_v25 = vmax.f32 %v600_v19, 0.0  ;;  %1919 = vmatpush3.bf16.msra.mxu1 %v2098_v16 }
 0x1a5   :  { %v752_v26 = vpack.c.bf16 %v706_v23, %v704_v20 }
 0x1a6   :  { %v753_v27 = vpack.c.bf16 %v707_v25, %v705_v24  ;;  %v603_v28 = vpop.f32.mrb[36].mxu0 }
 0x1a7   :  { %v604_v29 = vadd.f32 %v603_v28, %v2332_v21  ;;  %v605_v30 = vpop.f32.mrb[37].mxu0 }
 0x1a8   :  { %v606_v31 = vadd.f32 %v605_v30, %v2334_v22  ;;  %v607_v32 = vpop.f32.mrb[38].mxu0  ;;  %999 = vmatprep.mubr.bf16.mxu1 %v753_v27 }
 0x1a9   :  { %v608_v33 = vadd.f32 %v607_v32, %v2332_v21  ;;  %v609_v34 = vpop.f32.mrb[39].mxu0  ;;  %1000 = vmatmul.mubr.bf16.gmra.mrb[24].mxu1 %v752_v26  ;;  %v708_v36 = vmax.f32 %v604_v29, 0.0  ;;  %v2099_v26 = vld [vmem:[#allocation8 + $0x30] sm:$0xff]  }
 0x1aa   :  { %v610_v35 = vadd.f32 %v609_v34, %v2334_v22  ;;  %v709_v38 = vmax.f32 %v606_v31, 0.0  ;;  %1920 = vmatprep.subr.bf16.mxu1 %v2099_v26  ;;  %v2100_v34 = vld [vmem:[#allocation8 + $0x38] sm:$0xff]  }
 0x1ab   :  { %v710_v37 = vmax.f32 %v608_v33, 0.0  ;;  %1921 = vmatpush3.bf16.msra.mxu1 %v2099_v26 }
 0x1ac   :  { %v711_v39 = vmax.f32 %v610_v35, 0.0  ;;  %1922 = vmatprep.subr.bf16.mxu1 %v2100_v34 }
 0x1ad   :  { %v754_v40 = vpack.c.bf16 %v710_v37, %v708_v36 }
 0x1ae   :  { %v755_v41 = vpack.c.bf16 %v711_v39, %v709_v38  ;;  %v613_v42 = vpop.f32.mrb[40].mxu0 }
 0x1af   :  { %v614_v43 = vadd.f32 %v613_v42, %v2332_v21  ;;  %v615_v44 = vpop.f32.mrb[41].mxu0  ;;  %1923 = vmatpush3.bf16.msra.mxu1 %v2100_v34 }
 0x1b0   :  { %v616_v45 = vadd.f32 %v615_v44, %v2334_v22  ;;  %v617_v46 = vpop.f32.mrb[42].mxu0  ;;  %1007 = vmatprep.mubr.bf16.mxu1 %v755_v41 }
 0x1b1   :  { %v618_v47 = vadd.f32 %v617_v46, %v2332_v21  ;;  %v619_v48 = vpop.f32.mrb[43].mxu0  ;;  %1008 = vmatmul.mubr.bf16.gmra.mrb[28].mxu1 %v754_v40  ;;  %v712_v50 = vmax.f32 %v614_v43, 0.0 }
 0x1b2   :  { %v620_v49 = vadd.f32 %v619_v48, %v2334_v22  ;;  %v713_v52 = vmax.f32 %v616_v45, 0.0 }
 0x1b3   :  { %v714_v51 = vmax.f32 %v618_v47, 0.0 }
 0x1b4   :  { %v715_v53 = vmax.f32 %v620_v49, 0.0 }
 0x1b5   :  { %v756_v54 = vpack.c.bf16 %v714_v51, %v712_v50 }
 0x1b6   :  { %v757_v55 = vpack.c.bf16 %v715_v53, %v713_v52  ;;  %v623_v56 = vpop.f32.mrb[44].mxu0 }
 0x1b7   :  { %v624_v57 = vadd.f32 %v623_v56, %v2332_v21  ;;  %v625_v58 = vpop.f32.mrb[45].mxu0 }
 0x1b8   :  { %v626_v59 = vadd.f32 %v625_v58, %v2334_v22  ;;  %v627_v60 = vpop.f32.mrb[46].mxu0  ;;  %1015 = vmatprep.mubr.bf16.mxu1 %v757_v55 }
 0x1b9   :  { %v628_v61 = vadd.f32 %v627_v60, %v2332_v21  ;;  %v629_v62 = vpop.f32.mrb[47].mxu0  ;;  %1016 = vmatmul.mubr.bf16.gmra.mrb[32].mxu1 %v756_v54  ;;  %v716_v1 = vmax.f32 %v624_v57, 0.0 }
 0x1ba   :  { %v630_v63 = vadd.f32 %v629_v62, %v2334_v22  ;;  %v717_v3 = vmax.f32 %v626_v59, 0.0 }
 0x1bb   :  { %v718_v2 = vmax.f32 %v628_v61, 0.0 }
 0x1bc   :  { %v719_v4 = vmax.f32 %v630_v63, 0.0 }
 0x1bd   :  { %v758_v5 = vpack.c.bf16 %v718_v2, %v716_v1 }
 0x1be   :  { %v759_v6 = vpack.c.bf16 %v719_v4, %v717_v3  ;;  %v633_v7 = vpop.f32.mrb[48].mxu0 }
 0x1bf   :  { %v634_v9 = vadd.f32 %v633_v7, %v2332_v21  ;;  %v635_v10 = vpop.f32.mrb[49].mxu0 }
 0x1c0   :  { %v636_v11 = vadd.f32 %v635_v10, %v2334_v22  ;;  %v637_v12 = vpop.f32.mrb[50].mxu0  ;;  %1023 = vmatprep.mubr.bf16.mxu1 %v759_v6  ;;  %v2403_v6 = vld [vmem:[%s2493_s4] ss:$0 sm:$0xff] }
 0x1c1   :  { %v638_v13 = vadd.f32 %v637_v12, %v2332_v21  ;;  %v639_v14 = vpop.f32.mrb[51].mxu0  ;;  %1024 = vmatmul.mubr.bf16.gmra.mrb[36].mxu1 %v758_v5  ;;  %v720_v17 = vmax.f32 %v634_v9, 0.0 }
 0x1c2   :  { %v640_v15 = vadd.f32 %v639_v14, %v2334_v22  ;;  %v721_v19 = vmax.f32 %v636_v11, 0.0 }
 0x1c3   :  { %v722_v18 = vmax.f32 %v638_v13, 0.0 }
 0x1c4   :  { %v723_v20 = vmax.f32 %v640_v15, 0.0 }
 0x1c5   :  { %v760_v23 = vpack.c.bf16 %v722_v18, %v720_v17 }
 0x1c6   :  { %v761_v24 = vpack.c.bf16 %v723_v20, %v721_v19  ;;  %v643_v25 = vpop.f32.mrb[52].mxu0 }
 0x1c7   :  { %v644_v27 = vadd.f32 %v643_v25, %v2332_v21  ;;  %v645_v28 = vpop.f32.mrb[53].mxu0 }
 0x1c8   :  { %v646_v29 = vadd.f32 %v645_v28, %v2334_v22  ;;  %v647_v30 = vpop.f32.mrb[54].mxu0  ;;  %1031 = vmatprep.mubr.bf16.mxu1 %v761_v24 }
 0x1c9   :  { %v648_v31 = vadd.f32 %v647_v30, %v2332_v21  ;;  %v649_v32 = vpop.f32.mrb[55].mxu0  ;;  %1032 = vmatmul.mubr.bf16.gmra.mrb[40].mxu1 %v760_v23  ;;  %v724_v35 = vmax.f32 %v644_v27, 0.0 }
 0x1ca   :  { %v650_v33 = vadd.f32 %v649_v32, %v2334_v22  ;;  %v725_v37 = vmax.f32 %v646_v29, 0.0 }
 0x1cb   :  { %v726_v36 = vmax.f32 %v648_v31, 0.0 }
 0x1cc   :  { %v727_v38 = vmax.f32 %v650_v33, 0.0 }
 0x1cd   :  { %v762_v39 = vpack.c.bf16 %v726_v36, %v724_v35 }
 0x1ce   :  { %v763_v40 = vpack.c.bf16 %v727_v38, %v725_v37  ;;  %v653_v41 = vpop.f32.mrb[56].mxu0 }
 0x1cf   :  { %v654_v42 = vadd.f32 %v653_v41, %v2332_v21  ;;  %v655_v43 = vpop.f32.mrb[57].mxu0 }
 0x1d0   :  { %v656_v44 = vadd.f32 %v655_v43, %v2334_v22  ;;  %v657_v45 = vpop.f32.mrb[58].mxu0  ;;  %1039 = vmatprep.mubr.bf16.mxu1 %v763_v40 }
 0x1d1   :  { %v658_v46 = vadd.f32 %v657_v45, %v2332_v21  ;;  %v659_v47 = vpop.f32.mrb[59].mxu0  ;;  %1040 = vmatmul.mubr.bf16.gmra.mrb[44].mxu1 %v762_v39  ;;  %v728_v49 = vmax.f32 %v654_v42, 0.0 }
 0x1d2   :  { %v660_v48 = vadd.f32 %v659_v47, %v2334_v22  ;;  %v729_v51 = vmax.f32 %v656_v44, 0.0 }
 0x1d3   :  { %v730_v50 = vmax.f32 %v658_v46, 0.0 }
 0x1d4   :  { %v731_v52 = vmax.f32 %v660_v48, 0.0 }
 0x1d5   :  { %v764_v53 = vpack.c.bf16 %v730_v50, %v728_v49 }
 0x1d6   :  { %v765_v54 = vpack.c.bf16 %v731_v52, %v729_v51  ;;  %v663_v55 = vpop.f32.mrb[60].mxu0 }
 0x1d7   :  { %v664_v56 = vadd.f32 %v663_v55, %v2332_v21  ;;  %v665_v57 = vpop.f32.mrb[61].mxu0 }
 0x1d8   :  { %v666_v58 = vadd.f32 %v665_v57, %v2334_v22  ;;  %v667_v59 = vpop.f32.mrb[62].mxu0  ;;  %1047 = vmatprep.mubr.bf16.mxu1 %v765_v54 }
 0x1d9   :  { %v668_v60 = vadd.f32 %v667_v59, %v2332_v21  ;;  %v669_v61 = vpop.f32.mrb[63].mxu0  ;;  %1048 = vmatmul.mubr.bf16.gmra.mrb[48].mxu1 %v764_v53  ;;  %v732_v63 = vmax.f32 %v664_v56, 0.0 }
 0x1da   :  { %v670_v62 = vadd.f32 %v669_v61, %v2334_v22  ;;  %v733_v1 = vmax.f32 %v666_v58, 0.0 }
 0x1db   :  { %v734_v0 = vmax.f32 %v668_v60, 0.0 }
 0x1dc   :  { %v735_v2 = vmax.f32 %v670_v62, 0.0 }
 0x1dd   :  { %v766_v3 = vpack.c.bf16 %v734_v0, %v732_v63 }
 0x1de   :  { %v767_v4 = vpack.c.bf16 %v735_v2, %v733_v1 }
 0x1e0   :  { %1055 = vmatprep.mubr.bf16.mxu1 %v767_v4 }
 0x1e1   :  { %1056 = vmatmul.mubr.bf16.gmra.mrb[52].mxu1 %v766_v3 }
 0x23c   :  { %v1788_v5 = vpop.f32.mrb[64].mxu0 }
 0x23d   :  { %v1789_v7 = vpop.f32.mrb[65].mxu0 }
 0x23e   :  { %v1790_v21 = vadd.f32 %v1789_v7, %v1788_v5  ;;  %v1791_v8 = vpop.f32.mrb[66].mxu0 }
 0x23f   :  { %v1792_v9 = vpop.f32.mrb[67].mxu0 }
 0x240   :  { %v938_v22 = vadd.f32 %v1790_v21, %v2403_v6  ;;  %v1793_v10 = vadd.f32 %v1792_v9, %v1791_v8 }
 0x242   :  { %v941_v11 = vadd.f32 %v1793_v10, %v2403_v6  ;;  %v1064_v12 = vmax.f32 %v938_v22, 0.0 }
 0x244   :  { %v1065_v13 = vmax.f32 %v941_v11, 0.0  ;;  %v1794_v14 = vpop.f32.mrb[68].mxu0 }
 0x245   :  { %v1795_v15 = vpop.f32.mrb[69].mxu0 }
 0x246   :  { %v1796_v16 = vadd.f32 %v1795_v15, %v1794_v14  ;;  %v1797_v17 = vpop.f32.mrb[70].mxu0  ;;  %v1096_v18 = vpack.c.bf16 %v1065_v13, %v1064_v12 }
 0x247   :  { %v1798_v19 = vpop.f32.mrb[71].mxu0 }
 0x248   :  { %v946_v20 = vadd.f32 %v1796_v16, %v2403_v6  ;;  %v1799_v23 = vadd.f32 %v1798_v19, %v1797_v17  ;;  %1924 = vmatprep.mubr.bf16.mxu1 %v1096_v18 }
 0x24a   :  { %v949_v24 = vadd.f32 %v1799_v23, %v2403_v6  ;;  %v1066_v25 = vmax.f32 %v946_v20, 0.0 }
 0x24c   :  { %v1067_v26 = vmax.f32 %v949_v24, 0.0  ;;  %v1800_v27 = vpop.f32.mrb[0].mxu1 }
 0x24d   :  { %v1801_v28 = vpop.f32.mrb[1].mxu1 }
 0x24e   :  { %v1097_v29 = vpack.c.bf16 %v1067_v26, %v1066_v25  ;;  %v1802_v30 = vadd.f32 %v1801_v28, %v1800_v27  ;;  %v1803_v31 = vpop.f32.mrb[2].mxu1 }
 0x24f   :  { %v1804_v32 = vpop.f32.mrb[3].mxu1 }
 0x250   :  { %v954_v33 = vadd.f32 %v1802_v30, %v2403_v6  ;;  %v1805_v34 = vadd.f32 %v1804_v32, %v1803_v31  ;;  %1925 = vmatmul.mubr.bf16.vlgmr.msra.gmra.mrb[56].mxu1 %v1097_v29 }
 0x252   :  { %v957_v35 = vadd.f32 %v1805_v34, %v2403_v6  ;;  %v1068_v36 = vmax.f32 %v954_v33, 0.0 }
 0x254   :  { %v1069_v37 = vmax.f32 %v957_v35, 0.0  ;;  %v1806_v38 = vpop.f32.mrb[4].mxu1 }
 0x255   :  { %v1807_v39 = vpop.f32.mrb[5].mxu1 }
 0x256   :  { %v1808_v40 = vadd.f32 %v1807_v39, %v1806_v38  ;;  %v1809_v41 = vpop.f32.mrb[6].mxu1  ;;  %v1098_v42 = vpack.c.bf16 %v1069_v37, %v1068_v36 }
 0x257   :  { %v1810_v43 = vpop.f32.mrb[7].mxu1 }
 0x258   :  { %v962_v44 = vadd.f32 %v1808_v40, %v2403_v6  ;;  %v1811_v45 = vadd.f32 %v1810_v43, %v1809_v41  ;;  %1928 = vmatprep.mubr.bf16.mxu1 %v1098_v42 }
 0x25a   :  { %v965_v46 = vadd.f32 %v1811_v45, %v2403_v6  ;;  %v1070_v47 = vmax.f32 %v962_v44, 0.0 }
 0x25c   :  { %v1071_v48 = vmax.f32 %v965_v46, 0.0  ;;  %v1812_v49 = vpop.f32.mrb[8].mxu1 }
 0x25d   :  { %v1813_v50 = vpop.f32.mrb[9].mxu1 }
 0x25e   :  { %v1814_v51 = vadd.f32 %v1813_v50, %v1812_v49  ;;  %v1815_v52 = vpop.f32.mrb[10].mxu1  ;;  %v1099_v53 = vpack.c.bf16 %v1071_v48, %v1070_v47 }
 0x25f   :  { %v1816_v54 = vpop.f32.mrb[11].mxu1 }
 0x260   :  { %v970_v55 = vadd.f32 %v1814_v51, %v2403_v6  ;;  %v1817_v56 = vadd.f32 %v1816_v54, %v1815_v52  ;;  %1929 = vmatmul.mubr.bf16.gmra.mrb[60].mxu1 %v1099_v53 }
 0x262   :  { %v973_v57 = vadd.f32 %v1817_v56, %v2403_v6  ;;  %v1072_v58 = vmax.f32 %v970_v55, 0.0 }
 0x264   :  { %v1073_v59 = vmax.f32 %v973_v57, 0.0  ;;  %v1818_v60 = vpop.f32.mrb[12].mxu1 }
 0x265   :  { %v1819_v61 = vpop.f32.mrb[13].mxu1 }
 0x266   :  { %v1820_v62 = vadd.f32 %v1819_v61, %v1818_v60  ;;  %v1821_v63 = vpop.f32.mrb[14].mxu1  ;;  %v1100_v0 = vpack.c.bf16 %v1073_v59, %v1072_v58 }
 0x267   :  { %v1822_v1 = vpop.f32.mrb[15].mxu1 }
 0x268   :  { %v978_v2 = vadd.f32 %v1820_v62, %v2403_v6  ;;  %v1823_v3 = vadd.f32 %v1822_v1, %v1821_v63  ;;  %1932 = vmatprep.mubr.bf16.mxu1 %v1100_v0 }
 0x26a   :  { %v981_v4 = vadd.f32 %v1823_v3, %v2403_v6  ;;  %v1074_v5 = vmax.f32 %v978_v2, 0.0 }
 0x26c   :  { %v1075_v7 = vmax.f32 %v981_v4, 0.0  ;;  %v1824_v21 = vpop.f32.mrb[16].mxu1 }
 0x26d   :  { %v1825_v8 = vpop.f32.mrb[17].mxu1 }
 0x26e   :  { %v1826_v9 = vadd.f32 %v1825_v8, %v1824_v21  ;;  %v1827_v22 = vpop.f32.mrb[18].mxu1  ;;  %v1101_v10 = vpack.c.bf16 %v1075_v7, %v1074_v5 }
 0x26f   :  { %v1828_v11 = vpop.f32.mrb[19].mxu1 }
 0x270   :  { %v986_v12 = vadd.f32 %v1826_v9, %v2403_v6  ;;  %v1829_v13 = vadd.f32 %v1828_v11, %v1827_v22  ;;  %1933 = vmatmul.mubr.bf16.gmra.mrb[64].mxu1 %v1101_v10 }
 0x272   :  { %v989_v14 = vadd.f32 %v1829_v13, %v2403_v6  ;;  %v1076_v15 = vmax.f32 %v986_v12, 0.0 }
 0x274   :  { %v1077_v16 = vmax.f32 %v989_v14, 0.0  ;;  %v1830_v17 = vpop.f32.mrb[20].mxu1 }
 0x275   :  { %v1831_v18 = vpop.f32.mrb[21].mxu1 }
 0x276   :  { %v1832_v19 = vadd.f32 %v1831_v18, %v1830_v17  ;;  %v1833_v20 = vpop.f32.mrb[22].mxu1  ;;  %v1102_v23 = vpack.c.bf16 %v1077_v16, %v1076_v15 }
 0x277   :  { %v1834_v24 = vpop.f32.mrb[23].mxu1 }
 0x278   :  { %v994_v25 = vadd.f32 %v1832_v19, %v2403_v6  ;;  %v1835_v26 = vadd.f32 %v1834_v24, %v1833_v20  ;;  %1936 = vmatprep.mubr.bf16.mxu1 %v1102_v23 }
 0x27a   :  { %v997_v27 = vadd.f32 %v1835_v26, %v2403_v6  ;;  %v1078_v28 = vmax.f32 %v994_v25, 0.0 }
 0x27c   :  { %v1079_v29 = vmax.f32 %v997_v27, 0.0  ;;  %v1836_v30 = vpop.f32.mrb[24].mxu1 }
 0x27d   :  { %v1837_v31 = vpop.f32.mrb[25].mxu1 }
 0x27e   :  { %v1838_v32 = vadd.f32 %v1837_v31, %v1836_v30  ;;  %v1839_v33 = vpop.f32.mrb[26].mxu1  ;;  %v1103_v34 = vpack.c.bf16 %v1079_v29, %v1078_v28 }
 0x27f   :  { %v1840_v35 = vpop.f32.mrb[27].mxu1 }
 0x280   :  { %v1002_v36 = vadd.f32 %v1838_v32, %v2403_v6  ;;  %v1841_v37 = vadd.f32 %v1840_v35, %v1839_v33  ;;  %1937 = vmatmul.mubr.bf16.gmra.mrb[68].mxu1 %v1103_v34 }
 0x282   :  { %v1005_v38 = vadd.f32 %v1841_v37, %v2403_v6  ;;  %v1080_v39 = vmax.f32 %v1002_v36, 0.0 }
 0x284   :  { %v1081_v40 = vmax.f32 %v1005_v38, 0.0  ;;  %v1842_v41 = vpop.f32.mrb[28].mxu1 }
 0x285   :  { %v1843_v42 = vpop.f32.mrb[29].mxu1 }
 0x286   :  { %v1844_v43 = vadd.f32 %v1843_v42, %v1842_v41  ;;  %v1845_v44 = vpop.f32.mrb[30].mxu1  ;;  %v1104_v45 = vpack.c.bf16 %v1081_v40, %v1080_v39 }
 0x287   :  { %v1846_v46 = vpop.f32.mrb[31].mxu1 }
 0x288   :  { %v1010_v47 = vadd.f32 %v1844_v43, %v2403_v6  ;;  %v1847_v48 = vadd.f32 %v1846_v46, %v1845_v44  ;;  %1940 = vmatprep.mubr.bf16.mxu1 %v1104_v45 }
 0x28a   :  { %v1013_v49 = vadd.f32 %v1847_v48, %v2403_v6  ;;  %v1082_v50 = vmax.f32 %v1010_v47, 0.0 }
 0x28c   :  { %v1083_v51 = vmax.f32 %v1013_v49, 0.0  ;;  %v1848_v52 = vpop.f32.mrb[32].mxu1 }
 0x28d   :  { %v1849_v53 = vpop.f32.mrb[33].mxu1 }
 0x28e   :  { %v1850_v54 = vadd.f32 %v1849_v53, %v1848_v52  ;;  %v1851_v55 = vpop.f32.mrb[34].mxu1  ;;  %v1105_v56 = vpack.c.bf16 %v1083_v51, %v1082_v50 }
 0x28f   :  { %v1852_v57 = vpop.f32.mrb[35].mxu1 }
 0x290   :  { %v1018_v58 = vadd.f32 %v1850_v54, %v2403_v6  ;;  %v1853_v59 = vadd.f32 %v1852_v57, %v1851_v55  ;;  %1941 = vmatmul.mubr.bf16.gmra.mrb[72].mxu1 %v1105_v56  ;;  %v2440_v57 = vld [vmem:[%s2495_s6] ss:$0 sm:$0xff]  ;;  %s2227_s6 = smov [#allocation10]  }
 0x291   :  { %s1509_s30 = sshll.u32 %s2227_s6, 4  ;;  %s1510_s30 = int_to_ptr.vmem [resolvable:$true] %s1509_s30 }
 0x292   :  { %v1021_v60 = vadd.f32 %v1853_v59, %v2403_v6  ;;  %v1084_v61 = vmax.f32 %v1018_v58, 0.0  ;;  %s2189_s8 = scalar_lea.vmem %s1510_s30, 2048  ;;  %p2194_p5 = scmp.lt.s32.totalorder %s1510_s30, %s1510_s30 }
 0x293   :  { %p2190_p4 = scmp.ne.s32.totalorder %s1510_s30, %s2189_s8  ;;  %p2195_p6 = scmp.lt.s32.totalorder %s2189_s8, %s2189_s8 }
 0x294   :  { %v1085_v62 = vmax.f32 %v1021_v60, 0.0  ;;  %v1854_v63 = vpop.f32.mrb[36].mxu1 }
 0x295   :  { %v1855_v0 = vpop.f32.mrb[37].mxu1  ;;  %p2196_p7 = por %p2195_p6, %p2194_p5 }
 0x296   :  { %v1856_v1 = vadd.f32 %v1855_v0, %v1854_v63  ;;  %v1857_v2 = vpop.f32.mrb[38].mxu1  ;;  %v1106_v3 = vpack.c.bf16 %v1085_v62, %v1084_v61 }
 0x297   :  { %v1858_v4 = vpop.f32.mrb[39].mxu1  ;;  %p2197_p8 = pnand %p2196_p7, %p2190_p4 }
 0x298   :  { %v1026_v5 = vadd.f32 %v1856_v1, %v2403_v6  ;;  %v1859_v7 = vadd.f32 %v1858_v4, %v1857_v2  ;;  %1944 = vmatprep.mubr.bf16.mxu1 %v1106_v3 }
 0x29a   :  { %v1029_v21 = vadd.f32 %v1859_v7, %v2403_v6  ;;  %v1086_v8 = vmax.f32 %v1026_v5, 0.0 }
 0x29c   :  { %v1087_v9 = vmax.f32 %v1029_v21, 0.0  ;;  %v1860_v22 = vpop.f32.mrb[40].mxu1 }
 0x29d   :  { %v1861_v10 = vpop.f32.mrb[41].mxu1 }
 0x29e   :  { %v1862_v11 = vadd.f32 %v1861_v10, %v1860_v22  ;;  %v1863_v12 = vpop.f32.mrb[42].mxu1  ;;  %v1107_v13 = vpack.c.bf16 %v1087_v9, %v1086_v8 }
 0x29f   :  { %v1864_v14 = vpop.f32.mrb[43].mxu1 }
 0x2a0   :  { %v1034_v15 = vadd.f32 %v1862_v11, %v2403_v6  ;;  %v1865_v16 = vadd.f32 %v1864_v14, %v1863_v12  ;;  %1945 = vmatmul.mubr.bf16.gmra.mrb[76].mxu1 %v1107_v13 }
 0x2a2   :  { %v1037_v17 = vadd.f32 %v1865_v16, %v2403_v6  ;;  %v1088_v18 = vmax.f32 %v1034_v15, 0.0 }
 0x2a4   :  { %v1089_v19 = vmax.f32 %v1037_v17, 0.0  ;;  %v1866_v20 = vpop.f32.mrb[44].mxu1 }
 0x2a5   :  { %v1867_v23 = vpop.f32.mrb[45].mxu1 }
 0x2a6   :  { %v1868_v24 = vadd.f32 %v1867_v23, %v1866_v20  ;;  %v1869_v25 = vpop.f32.mrb[46].mxu1  ;;  %v1108_v26 = vpack.c.bf16 %v1089_v19, %v1088_v18 }
 0x2a7   :  { %v1870_v27 = vpop.f32.mrb[47].mxu1 }
 0x2a8   :  { %v1042_v28 = vadd.f32 %v1868_v24, %v2403_v6  ;;  %v1871_v29 = vadd.f32 %v1870_v27, %v1869_v25  ;;  %1948 = vmatprep.mubr.bf16.mxu1 %v1108_v26 }
 0x2aa   :  { %v1045_v30 = vadd.f32 %v1871_v29, %v2403_v6  ;;  %v1090_v31 = vmax.f32 %v1042_v28, 0.0 }
 0x2ac   :  { %v1091_v32 = vmax.f32 %v1045_v30, 0.0  ;;  %v1872_v33 = vpop.f32.mrb[48].mxu1 }
 0x2ad   :  { %v1873_v34 = vpop.f32.mrb[49].mxu1 }
 0x2ae   :  { %v1874_v35 = vadd.f32 %v1873_v34, %v1872_v33  ;;  %v1875_v36 = vpop.f32.mrb[50].mxu1  ;;  %v1109_v37 = vpack.c.bf16 %v1091_v32, %v1090_v31 }
 0x2af   :  { %v1876_v38 = vpop.f32.mrb[51].mxu1 }
 0x2b0   :  { %v1050_v39 = vadd.f32 %v1874_v35, %v2403_v6  ;;  %v1877_v40 = vadd.f32 %v1876_v38, %v1875_v36  ;;  %1949 = vmatmul.mubr.bf16.gmra.mrb[80].mxu1 %v1109_v37 }
 0x2b2   :  { %v1053_v41 = vadd.f32 %v1877_v40, %v2403_v6  ;;  %v1092_v42 = vmax.f32 %v1050_v39, 0.0 }
 0x2b4   :  { %v1093_v43 = vmax.f32 %v1053_v41, 0.0  ;;  %v1878_v44 = vpop.f32.mrb[52].mxu1 }
 0x2b5   :  { %v1879_v45 = vpop.f32.mrb[53].mxu1 }
 0x2b6   :  { %v1880_v46 = vadd.f32 %v1879_v45, %v1878_v44  ;;  %v1881_v47 = vpop.f32.mrb[54].mxu1  ;;  %v1110_v48 = vpack.c.bf16 %v1093_v43, %v1092_v42 }
 0x2b7   :  { %v1882_v49 = vpop.f32.mrb[55].mxu1 }
 0x2b8   :  { %v1058_v50 = vadd.f32 %v1880_v46, %v2403_v6  ;;  %v1883_v51 = vadd.f32 %v1882_v49, %v1881_v47  ;;  %1952 = vmatprep.mubr.bf16.mxu1 %v1110_v48 }
 0x2ba   :  { %v1061_v52 = vadd.f32 %v1883_v51, %v2403_v6  ;;  %v1094_v53 = vmax.f32 %v1058_v50, 0.0 }
 0x2bc   :  { %v1095_v54 = vmax.f32 %v1061_v52, 0.0 }
 0x2be   :  { %v1111_v55 = vpack.c.bf16 %v1095_v54, %v1094_v53 }
 0x2c0   :  { %1953 = vmatmul.mubr.bf16.gmra.mrb[84].mxu1 %v1111_v55 }
 0x323   :  { %v1926_v56 = vpop.f32.mrb[56].mxu1 }
 0x324   :  { %v1217_v58 = vpop.f32.mrb[57].mxu1  ;;  %v1226_v60 = vadd.f32 %v1926_v56, %v2440_v57 }
 0x325   :  { %v1927_v59 = vpop.f32.mrb[58].mxu1  ;;  %v1218_v63 = vadd.f32 %v2440_v57, %v1217_v58 }
 0x326   :  { %v1229_v61 = vadd.f32 %v1927_v59, %v2440_v57  ;;  %v1220_v62 = vpop.f32.mrb[59].mxu1 }
 0x327   :  { %v1221_v6 = vadd.f32 %v2440_v57, %v1220_v62 }
 0x328   :  { %v1685_v0 = vpack.c.bf16 %v1229_v61, %v1226_v60 }
 0x329   :  { %v1680_v1 = vpack.c.bf16 %v1221_v6, %v1218_v63 }
 0x32a   :  { %1757 = vst [vmem:[#allocation10 + $0x8] sm:$0xff] %v1685_v0  }
 0x32b   :  { %1681 = vst [vmem:[#allocation10] sm:$0xff] %v1680_v1  }
 0x333   :  { %v1930_v2 = vpop.f32.mrb[60].mxu1 }
 0x334   :  { %v1233_v3 = vpop.f32.mrb[61].mxu1  ;;  %v1242_v5 = vadd.f32 %v1930_v2, %v2440_v57 }
 0x335   :  { %v1931_v4 = vpop.f32.mrb[62].mxu1  ;;  %v1234_v8 = vadd.f32 %v2440_v57, %v1233_v3 }
 0x336   :  { %v1245_v7 = vadd.f32 %v1931_v4, %v2440_v57  ;;  %v1236_v21 = vpop.f32.mrb[63].mxu1 }
 0x337   :  { %v1237_v9 = vadd.f32 %v2440_v57, %v1236_v21 }
 0x338   :  { %v1695_v22 = vpack.c.bf16 %v1245_v7, %v1242_v5 }
 0x339   :  { %v1690_v10 = vpack.c.bf16 %v1237_v9, %v1234_v8 }
 0x33a   :  { %1759 = vst [vmem:[#allocation10 + $0x18] sm:$0xff] %v1695_v22  }
 0x33b   :  { %1758 = vst [vmem:[#allocation10 + $0x10] sm:$0xff] %v1690_v10  }
 0x343   :  { %v1934_v11 = vpop.f32.mrb[64].mxu1 }
 0x344   :  { %v1249_v12 = vpop.f32.mrb[65].mxu1  ;;  %v1258_v14 = vadd.f32 %v1934_v11, %v2440_v57 }
 0x345   :  { %v1935_v13 = vpop.f32.mrb[66].mxu1  ;;  %v1250_v17 = vadd.f32 %v2440_v57, %v1249_v12 }
 0x346   :  { %v1261_v15 = vadd.f32 %v1935_v13, %v2440_v57  ;;  %v1252_v16 = vpop.f32.mrb[67].mxu1 }
 0x347   :  { %v1253_v18 = vadd.f32 %v2440_v57, %v1252_v16 }
 0x348   :  { %v1705_v19 = vpack.c.bf16 %v1261_v15, %v1258_v14 }
 0x349   :  { %v1700_v20 = vpack.c.bf16 %v1253_v18, %v1250_v17 }
 0x34a   :  { %1761 = vst [vmem:[#allocation10 + $0x28] sm:$0xff] %v1705_v19  }
 0x34b   :  { %1760 = vst [vmem:[#allocation10 + $0x20] sm:$0xff] %v1700_v20  }
 0x353   :  { %v1938_v23 = vpop.f32.mrb[68].mxu1 }
 0x354   :  { %v1265_v24 = vpop.f32.mrb[69].mxu1  ;;  %v1274_v26 = vadd.f32 %v1938_v23, %v2440_v57 }
 0x355   :  { %v1939_v25 = vpop.f32.mrb[70].mxu1  ;;  %v1266_v29 = vadd.f32 %v2440_v57, %v1265_v24 }
 0x356   :  { %v1277_v27 = vadd.f32 %v1939_v25, %v2440_v57  ;;  %v1268_v28 = vpop.f32.mrb[71].mxu1 }
 0x357   :  { %v1269_v30 = vadd.f32 %v2440_v57, %v1268_v28 }
 0x358   :  { %v1715_v31 = vpack.c.bf16 %v1277_v27, %v1274_v26 }
 0x359   :  { %v1710_v32 = vpack.c.bf16 %v1269_v30, %v1266_v29 }
 0x35a   :  { %1763 = vst [vmem:[#allocation10 + $0x38] sm:$0xff] %v1715_v31  }
 0x35b   :  { %1762 = vst [vmem:[#allocation10 + $0x30] sm:$0xff] %v1710_v32  }
 0x363   :  { %v1942_v33 = vpop.f32.mrb[72].mxu1 }
 0x364   :  { %v1281_v34 = vpop.f32.mrb[73].mxu1  ;;  %v1290_v36 = vadd.f32 %v1942_v33, %v2440_v57 }
 0x365   :  { %v1943_v35 = vpop.f32.mrb[74].mxu1  ;;  %v1282_v39 = vadd.f32 %v2440_v57, %v1281_v34 }
 0x366   :  { %v1293_v37 = vadd.f32 %v1943_v35, %v2440_v57  ;;  %v1284_v38 = vpop.f32.mrb[75].mxu1 }
 0x367   :  { %v1285_v40 = vadd.f32 %v2440_v57, %v1284_v38 }
 0x368   :  { %v1725_v41 = vpack.c.bf16 %v1293_v37, %v1290_v36 }
 0x369   :  { %v1720_v42 = vpack.c.bf16 %v1285_v40, %v1282_v39 }
 0x36a   :  { %1765 = vst [vmem:[#allocation10 + $0x48] sm:$0xff] %v1725_v41  }
 0x36b   :  { %1764 = vst [vmem:[#allocation10 + $0x40] sm:$0xff] %v1720_v42  }
 0x373   :  { %v1946_v43 = vpop.f32.mrb[76].mxu1 }
 0x374   :  { %v1297_v44 = vpop.f32.mrb[77].mxu1  ;;  %v1306_v46 = vadd.f32 %v1946_v43, %v2440_v57 }
 0x375   :  { %v1947_v45 = vpop.f32.mrb[78].mxu1  ;;  %v1298_v49 = vadd.f32 %v2440_v57, %v1297_v44 }
 0x376   :  { %v1309_v47 = vadd.f32 %v1947_v45, %v2440_v57  ;;  %v1300_v48 = vpop.f32.mrb[79].mxu1 }
 0x377   :  { %v1301_v50 = vadd.f32 %v2440_v57, %v1300_v48 }
 0x378   :  { %v1735_v51 = vpack.c.bf16 %v1309_v47, %v1306_v46 }
 0x379   :  { %v1730_v52 = vpack.c.bf16 %v1301_v50, %v1298_v49 }
 0x37a   :  { %1767 = vst [vmem:[#allocation10 + $0x58] sm:$0xff] %v1735_v51  }
 0x37b   :  { %1766 = vst [vmem:[#allocation10 + $0x50] sm:$0xff] %v1730_v52  }
 0x383   :  { %v1950_v53 = vpop.f32.mrb[80].mxu1 }
 0x384   :  { %v1313_v54 = vpop.f32.mrb[81].mxu1  ;;  %v1322_v56 = vadd.f32 %v1950_v53, %v2440_v57 }
 0x385   :  { %v1951_v55 = vpop.f32.mrb[82].mxu1  ;;  %v1314_v60 = vadd.f32 %v2440_v57, %v1313_v54 }
 0x386   :  { %v1325_v58 = vadd.f32 %v1951_v55, %v2440_v57  ;;  %v1316_v59 = vpop.f32.mrb[83].mxu1 }
 0x387   :  { %v1317_v61 = vadd.f32 %v2440_v57, %v1316_v59 }
 0x388   :  { %v1745_v62 = vpack.c.bf16 %v1325_v58, %v1322_v56 }
 0x389   :  { %v1740_v63 = vpack.c.bf16 %v1317_v61, %v1314_v60 }
 0x38a   :  { %1769 = vst [vmem:[#allocation10 + $0x68] sm:$0xff] %v1745_v62  }
 0x38b   :  { %1768 = vst [vmem:[#allocation10 + $0x60] sm:$0xff] %v1740_v63  }
 0x393   :  { %v1954_v6 = vpop.f32.mrb[84].mxu1 }
 0x394   :  { %v1329_v0 = vpop.f32.mrb[85].mxu1  ;;  %v1338_v2 = vadd.f32 %v1954_v6, %v2440_v57 }
 0x395   :  { %v1955_v1 = vpop.f32.mrb[86].mxu1  ;;  %v1330_v5 = vadd.f32 %v2440_v57, %v1329_v0 }
 0x396   :  { %v1341_v3 = vadd.f32 %v1955_v1, %v2440_v57  ;;  %v1332_v4 = vpop.f32.mrb[87].mxu1 }
 0x397   :  { %v1333_v7 = vadd.f32 %v2440_v57, %v1332_v4 }
 0x398   :  { %v1755_v21 = vpack.c.bf16 %v1341_v3, %v1338_v2 }
 0x399   :  { %v1750_v8 = vpack.c.bf16 %v1333_v7, %v1330_v5 }
 0x39a   :  { %1771 = vst [vmem:[#allocation10 + $0x78] sm:$0xff] %v1755_v21  }
 0x39b   :  { %1770 = vst [vmem:[#allocation10 + $0x70] sm:$0xff] %v1750_v8  }
 0x39c   :  { %2200 = shalt.err (!%p2197_p8)
}
 0x39d   :  { %s2201_s11 = scalar_lea.hbm %s2496_s7, 2048 }
 0x39e   :  { %p2202_p9 = scmp.ne.s32.totalorder %s2496_s7, %s2201_s11  ;;  %p2205_p10 = scmp.lt.u32.totalorder %s2201_s11, %s2496_s7 }
 0x3a0   :  { %p2207_p11 = pnand %p2205_p10, %p2202_p9 }
 0x3a2   :  { %2210 = shalt.err (!%p2207_p11)
}
 0x3a3   :  { %1515 = dma.vmem_to_hbm [thread:$0]  %s1510_s30, 2048, %s2496_s7, [#allocation4], %s2224_s0, %s2224_s0, %s2225_s27  }
 0x3a4   :  { %2217 = dma.done.wait [#allocation4], 2048  }
 0x3a5   :  { %2218 = vsyncadd [#allocation4], 4294965248 }
 0x3a6   :  { %1519 = vsyncpa [#allocation3], 1 }
 0x3a7   :  { %1520 = vsyncpa [#allocation6], 1 }
 0x3a8   :  { %1521 = vsyncpa [#allocation9], 1 }
 0x3a9   :  { %1522 = vsyncpa [#allocation4], 1 }

</bundles_post_ra>
